<compile_context>
chip_gen: v7x
topology: tpu7x:2x2x1
jax: 0.10.0
libtpu: 0.0.40
codegen_flags: <defaults>
</compile_context>

<pallas_src>
import jax
import jax.numpy as jnp
from jax import lax
from jax.experimental import pallas as pl
from jax.experimental.pallas import tpu as pltpu


# ----------------------------------------------------------------------------
# Fused multi-layer LSTM kernel (single grid step; everything VMEM-resident)
# ----------------------------------------------------------------------------
def _make_fused_lstm_kernel(num_layers, T, B, H):
    def kernel(*args):
        x_ref = args[0]                              # (T*B, D)      time-major rows
        w_refs = args[1:1 + 3 * num_layers]          # per layer: W_ih^T, W_hh^T, bias
        out_ref = args[1 + 3 * num_layers]           # (T*B, H)      also inter-layer buf
        hN_ref = args[2 + 3 * num_layers]            # (L, B, H)
        cN_ref = args[3 + 3 * num_layers]            # (L, B, H)
        pg_sc = args[4 + 3 * num_layers]             # (T*B, 4H)     pre-gate scratch

        # Lane mask for the tanh ("g") gate segment [2H, 3H). Hoisted out of all loops
        # (broadcast_in_dim is not CSE'd by JAX).
        lane = lax.broadcasted_iota(jnp.int32, (B, 4 * H), 1)
        is_g_lane = (lane >= 2 * H) & (lane < 3 * H)

        for layer in range(num_layers):
            wih_ref = w_refs[3 * layer + 0]          # (D_l, 4H)
            whh_ref = w_refs[3 * layer + 1]          # (H,   4H)
            b_ref = w_refs[3 * layer + 2]            # (1,   4H)  (b_ih + b_hh)

            # Batched input projection for ALL timesteps: one big MXU matmul.
            src = x_ref[...] if layer == 0 else out_ref[...]
            pg_sc[...] = (
                jnp.dot(src, wih_ref[...], preferred_element_type=jnp.float32)
                + b_ref[...])

            whh = whh_ref[...]                       # resident across the time loop

            def step(t, carry, whh=whh):
                h_prev, c_prev = carry
                r0 = pl.multiple_of(t * B, B)
                gates = pg_sc[pl.ds(r0, B), :] + jnp.dot(
                    h_prev, whh, preferred_element_type=jnp.float32)   # (B, 4H)
                # Activate the whole (B, 4H) vreg once, then take gate views.
                act = jnp.where(is_g_lane, jnp.tanh(gates), jax.nn.sigmoid(gates))
                i_g = act[:, 0 * H:1 * H]
                f_g = act[:, 1 * H:2 * H]
                g_g = act[:, 2 * H:3 * H]
                o_g = act[:, 3 * H:4 * H]
                c_new = f_g * c_prev + i_g * g_g
                h_new = o_g * jnp.tanh(c_new)
                out_ref[pl.ds(r0, B), :] = h_new
                return (h_new, c_new)

            h0 = jnp.zeros((B, H), jnp.float32)
            c0 = jnp.zeros((B, H), jnp.float32)
            h_last, c_last = lax.fori_loop(0, T, step, (h0, c0), unroll=True)

            hN_ref[layer] = h_last
            cN_ref[layer] = c_last

    return kernel


def _fused_lstm_pallas(x2d, layer_weights, T, B, H):
    """x2d: (T*B, D) time-major rows. layer_weights: tuple of (W_ih^T, W_hh^T, bias)."""
    TB, D = x2d.shape
    num_layers = len(layer_weights)
    H4 = 4 * H

    in_specs = [pl.BlockSpec((TB, D), lambda i: (0, 0))]
    flat_inputs = [x2d]
    for (wih_t, whh_t, b) in layer_weights:
        d_in = wih_t.shape[0]
        in_specs += [
            pl.BlockSpec((d_in, H4), lambda i: (0, 0)),
            pl.BlockSpec((H, H4), lambda i: (0, 0)),
            pl.BlockSpec((1, H4), lambda i: (0, 0)),
        ]
        flat_inputs += [wih_t, whh_t, b]

    out_specs = (
        pl.BlockSpec((TB, H), lambda i: (0, 0)),
        pl.BlockSpec((num_layers, B, H), lambda i: (0, 0, 0)),
        pl.BlockSpec((num_layers, B, H), lambda i: (0, 0, 0)),
    )
    out_shapes = (
        jax.ShapeDtypeStruct((TB, H), jnp.float32),
        jax.ShapeDtypeStruct((num_layers, B, H), jnp.float32),
        jax.ShapeDtypeStruct((num_layers, B, H), jnp.float32),
    )

    grid_spec = pltpu.PrefetchScalarGridSpec(
        num_scalar_prefetch=0,
        grid=(1,),                                   # single invocation, all resident
        in_specs=in_specs,
        out_specs=out_specs,
        scratch_shapes=[pltpu.VMEM((TB, H4), jnp.float32)],   # pre-gate buffer
    )

    kernel = _make_fused_lstm_kernel(num_layers, T, B, H)
    return pl.pallas_call(
        kernel,
        out_shape=out_shapes,
        grid_spec=grid_spec,
        compiler_params=pltpu.CompilerParams(
            dimension_semantics=("arbitrary",)),     # sequential recurrence
    )(*flat_inputs)


# ----------------------------------------------------------------------------
# Module wrapper: VariableLengthLSTM.forward
# ----------------------------------------------------------------------------
def prepare_lstm_params(params):
    """One-time hoist: transpose weights and combine biases outside the forward path."""
    prepared = []
    for p in params:
        prepared.append((
            jnp.asarray(p["w_ih"], jnp.float32).T,              # (D_in, 4H)
            jnp.asarray(p["w_hh"], jnp.float32).T,              # (H, 4H)
            (jnp.asarray(p["b_ih"], jnp.float32)
             + jnp.asarray(p["b_hh"], jnp.float32))[None, :],   # (1, 4H)
        ))
    return tuple(prepared)


@jax.jit
def variable_length_lstm_forward(word_emb, prepared_params):
    """word_emb: (B, T, word_emb_len) batch_first.

    Returns (output, (h_n, c_n)) matching torch.nn.LSTM(batch_first=True):
      output: (B, T, H), h_n / c_n: (num_layers, B, H)
    """
    B, T, D = word_emb.shape
    H = prepared_params[0][1].shape[0]

    # Time-major rows so the input projection is one (T*B, D) matmul per layer.
    x2d = jnp.transpose(word_emb, (1, 0, 2)).reshape(T * B, D).astype(jnp.float32)
    out2d, h_n, c_n = _fused_lstm_pallas(x2d, prepared_params, T, B, H)
    output = jnp.transpose(out2d.reshape(T, B, H), (1, 0, 2))   # back to batch_first
    return output, (h_n, c_n)


# ----------------------------------------------------------------------------
# Pure-JAX reference (for correctness check)
# ----------------------------------------------------------------------------
def _lstm_ref(word_emb, params):
    B = word_emb.shape[0]
    layer_in = jnp.transpose(word_emb, (1, 0, 2)).astype(jnp.float32)  # (T, B, D)
    h_ns, c_ns = [], []
    for p in params:
        w_ih, w_hh, b_ih, b_hh = p["w_ih"], p["w_hh"], p["b_ih"], p["b_hh"]
        H = w_hh.shape[1]

        def step(carry, x_t):
            h, c = carry
            gates = x_t @ w_ih.T + b_ih + h @ w_hh.T + b_hh
            i, f, g, o = jnp.split(gates, 4, axis=-1)
            i = jax.nn.sigmoid(i)
            f = jax.nn.sigmoid(f)
            g = jnp.tanh(g)
            o = jax.nn.sigmoid(o)
            c = f * c + i * g
            h = o * jnp.tanh(c)
            return (h, c), h

        h0 = jnp.zeros((B, H), jnp.float32)
        c0 = jnp.zeros((B, H), jnp.float32)
        (hN, cN), outs = lax.scan(step, (h0, c0), layer_in)
        layer_in = outs
        h_ns.append(hN)
        c_ns.append(cN)
    return (jnp.transpose(layer_in, (1, 0, 2)),
            (jnp.stack(h_ns), jnp.stack(c_ns)))


# ----------------------------------------------------------------------------
# Deterministic parameter init (PyTorch LSTM default: U(-1/sqrt(H), 1/sqrt(H)))
# ----------------------------------------------------------------------------
def init_lstm_params(key, input_size, hidden_size, num_layers):
    k = 1.0 / jnp.sqrt(hidden_size)
    params = []
    for layer in range(num_layers):
        d_in = input_size if layer == 0 else hidden_size
        key, k1, k2, k3, k4 = jax.random.split(key, 5)
        params.append({
            "w_ih": jax.random.uniform(k1, (4 * hidden_size, d_in), jnp.float32, -k, k),
            "w_hh": jax.random.uniform(k2, (4 * hidden_size, hidden_size), jnp.float32, -k, k),
            "b_ih": jax.random.uniform(k3, (4 * hidden_size,), jnp.float32, -k, k),
            "b_hh": jax.random.uniform(k4, (4 * hidden_size,), jnp.float32, -k, k),
        })
    return params


if __name__ == "__main__":
    # config equivalent: no_hidden_LSTM=32, no_LSTM_cell=2, word_embedding_dim=16
    num_hidden = 32
    depth = 2
    word_emb_len = 2 * 16      # = 32
    B, T = 2, 8

    key = jax.random.PRNGKey(0)
    key, k_x, k_p = jax.random.split(key, 3)
    word_emb = jax.random.normal(k_x, (B, T, word_emb_len), jnp.float32)
    params = init_lstm_params(k_p, word_emb_len, num_hidden, depth)
    prepared = prepare_lstm_params(params)   # one-time weight transpose / bias combine

    out, (h_n, c_n) = variable_length_lstm_forward(word_emb, prepared)
    jax.block_until_ready(out)
    jax.block_until_ready(h_n)
    jax.block_until_ready(c_n)

    # correctness check vs pure-JAX reference
    ref_out, (ref_h, ref_c) = _lstm_ref(word_emb, params)
    assert out.shape == (B, T, num_hidden)
    assert h_n.shape == (depth, B, num_hidden) and c_n.shape == (depth, B, num_hidden)
    assert jnp.allclose(out, ref_out, atol=1e-5, rtol=1e-5)
    assert jnp.allclose(h_n, ref_h, atol=1e-5, rtol=1e-5)
    assert jnp.allclose(c_n, ref_c, atol=1e-5, rtol=1e-5)

    # TODO(synk): despite the module name, the PyTorch forward has no per-example
    # sequence-length handling (no pack_padded_sequence), so none is implemented here.
    print("KERNEL_OK")
</pallas_src>

<mosaic_0001>
module attributes {stable_mosaic.version = 11 : i64} {
  func.func @kernel(%arg0: i32, %arg1: memref<16x32xf32, #tpu.memory_space<vmem>>, %arg2: memref<32x128xf32, #tpu.memory_space<vmem>>, %arg3: memref<32x128xf32, #tpu.memory_space<vmem>>, %arg4: memref<1x128xf32, #tpu.memory_space<vmem>>, %arg5: memref<32x128xf32, #tpu.memory_space<vmem>>, %arg6: memref<32x128xf32, #tpu.memory_space<vmem>>, %arg7: memref<1x128xf32, #tpu.memory_space<vmem>>, %arg8: memref<16x32xf32, #tpu.memory_space<vmem>>, %arg9: memref<2x2x32xf32, #tpu.memory_space<vmem>>, %arg10: memref<2x2x32xf32, #tpu.memory_space<vmem>>, %arg11: memref<16x128xf32, #tpu.memory_space<vmem>>) attributes {dimension_semantics = [#tpu.dimension_semantics<arbitrary>], iteration_bounds = array<i64: 1>, scalar_prefetch = 0 : i64, scratch_operands = 1 : i64, tpu.core_type = #tpu.core_type<tc>, window_params = [{pipeline_mode = #tpu.pipeline_mode<synchronous>, transform_indices = @transform_0, window_bounds = array<i64: 16, 32>}, {pipeline_mode = #tpu.pipeline_mode<synchronous>, transform_indices = @transform_1, window_bounds = array<i64: 32, 128>}, {pipeline_mode = #tpu.pipeline_mode<synchronous>, transform_indices = @transform_2, window_bounds = array<i64: 32, 128>}, {pipeline_mode = #tpu.pipeline_mode<synchronous>, transform_indices = @transform_3, window_bounds = array<i64: 1, 128>}, {pipeline_mode = #tpu.pipeline_mode<synchronous>, transform_indices = @transform_4, window_bounds = array<i64: 32, 128>}, {pipeline_mode = #tpu.pipeline_mode<synchronous>, transform_indices = @transform_5, window_bounds = array<i64: 32, 128>}, {pipeline_mode = #tpu.pipeline_mode<synchronous>, transform_indices = @transform_6, window_bounds = array<i64: 1, 128>}, {pipeline_mode = #tpu.pipeline_mode<synchronous>, transform_indices = @transform_7, window_bounds = array<i64: 16, 32>}, {pipeline_mode = #tpu.pipeline_mode<synchronous>, transform_indices = @transform_8, window_bounds = array<i64: 2, 2, 32>}, {pipeline_mode = #tpu.pipeline_mode<synchronous>, transform_indices = @transform_9, window_bounds = array<i64: 2, 2, 32>}]} {
    %0 = tpu.iota {dimensions = array<i32: 1>} : vector<2x128xi32>
    %c64_i32 = arith.constant 64 : i32
    %1 = vector.broadcast %c64_i32 : i32 to vector<2x128xi32>
    %2 = arith.cmpi sge, %0, %1 : vector<2x128xi32>
    %c96_i32 = arith.constant 96 : i32
    %3 = vector.broadcast %c96_i32 : i32 to vector<2x128xi32>
    %4 = arith.cmpi slt, %0, %3 : vector<2x128xi32>
    %5 = arith.andi %2, %4 : vector<2x128xi1>
    %c0 = arith.constant 0 : index
    %c0_0 = arith.constant 0 : index
    %6 = vector.load %arg1[%c0, %c0_0] : memref<16x32xf32, #tpu.memory_space<vmem>>, vector<16x32xf32>
    %c0_1 = arith.constant 0 : index
    %c0_2 = arith.constant 0 : index
    %7 = vector.load %arg2[%c0_1, %c0_2] : memref<32x128xf32, #tpu.memory_space<vmem>>, vector<32x128xf32>
    %cst = arith.constant dense<0.000000e+00> : vector<16x128xf32>
    %8 = tpu.matmul %6, %7, %cst {dimension_numbers = #tpu.dot_dimension_numbers<[1], [0], [0], [1], [0, 0, 1, 1], [], []>} : vector<16x32xf32>, vector<32x128xf32>, vector<16x128xf32> -> vector<16x128xf32>
    %c0_3 = arith.constant 0 : index
    %c0_4 = arith.constant 0 : index
    %9 = vector.load %arg4[%c0_3, %c0_4] : memref<1x128xf32, #tpu.memory_space<vmem>>, vector<1x128xf32>
    %10 = vector.broadcast %9 : vector<1x128xf32> to vector<16x128xf32>
    %11 = arith.addf %8, %10 : vector<16x128xf32>
    %c0_5 = arith.constant 0 : index
    %c0_6 = arith.constant 0 : index
    %12 = vector.load %arg11[%c0_5, %c0_6] : memref<16x128xf32, #tpu.memory_space<vmem>>, vector<16x128xf32>
    tpu.vector_store %arg11[%c0_5, %c0_6], %11 {strides = array<i32>} : memref<16x128xf32, #tpu.memory_space<vmem>>, vector<16x128xf32>,
    %c0_7 = arith.constant 0 : index
    %c0_8 = arith.constant 0 : index
    %13 = vector.load %arg3[%c0_7, %c0_8] : memref<32x128xf32, #tpu.memory_space<vmem>>, vector<32x128xf32>
    %cst_9 = arith.constant 0.000000e+00 : f32
    %14 = vector.broadcast %cst_9 : f32 to vector<2x32xf32>
    %cst_10 = arith.constant 0.000000e+00 : f32
    %15 = vector.broadcast %cst_10 : f32 to vector<2x32xf32>
    %c0_i32 = arith.constant 0 : i32
    %c2_i32 = arith.constant 2 : i32
    %16 = arith.muli %c0_i32, %c2_i32 : i32
    %17 = tpu.assume_multiple %16, 2 : i32
    %18 = arith.index_cast %17 : i32 to index
    %c0_11 = arith.constant 0 : index
    %19 = vector.load %arg11[%18, %c0_11] : memref<16x128xf32, #tpu.memory_space<vmem>>, vector<2x128xf32>
    %cst_12 = arith.constant dense<0.000000e+00> : vector<2x128xf32>
    %20 = tpu.matmul %14, %13, %cst_12 {dimension_numbers = #tpu.dot_dimension_numbers<[1], [0], [0], [1], [0, 0, 1, 1], [], []>} : vector<2x32xf32>, vector<32x128xf32>, vector<2x128xf32> -> vector<2x128xf32>
    %21 = arith.addf %19, %20 : vector<2x128xf32>
    %22 = math.tanh %21 : vector<2x128xf32>
    %23 = arith.negf %21 : vector<2x128xf32>
    %24 = math.exp %23 : vector<2x128xf32>
    %cst_13 = arith.constant 1.000000e+00 : f32
    %25 = vector.broadcast %cst_13 : f32 to vector<2x128xf32>
    %26 = arith.addf %25, %24 : vector<2x128xf32>
    %27 = arith.divf %25, %26 : vector<2x128xf32>
    %28 = arith.select %5, %22, %27 : vector<2x128xi1>, vector<2x128xf32>
    %29 = vector.extract_strided_slice %28 {offsets = [0, 0], sizes = [2, 32], strides = [1, 1]} : vector<2x128xf32> to vector<2x32xf32>
    %30 = vector.extract_strided_slice %28 {offsets = [0, 32], sizes = [2, 32], strides = [1, 1]} : vector<2x128xf32> to vector<2x32xf32>
    %31 = vector.extract_strided_slice %28 {offsets = [0, 64], sizes = [2, 32], strides = [1, 1]} : vector<2x128xf32> to vector<2x32xf32>
    %32 = vector.extract_strided_slice %28 {offsets = [0, 96], sizes = [2, 32], strides = [1, 1]} : vector<2x128xf32> to vector<2x32xf32>
    %33 = arith.mulf %30, %15 : vector<2x32xf32>
    %34 = arith.mulf %29, %31 : vector<2x32xf32>
    %35 = arith.addf %33, %34 : vector<2x32xf32>
    %36 = math.tanh %35 : vector<2x32xf32>
    %37 = arith.mulf %32, %36 : vector<2x32xf32>
    %38 = arith.index_cast %17 : i32 to index
    %c0_14 = arith.constant 0 : index
    %39 = vector.load %arg8[%38, %c0_14] : memref<16x32xf32, #tpu.memory_space<vmem>>, vector<2x32xf32>
    tpu.vector_store %arg8[%38, %c0_14], %37 {strides = array<i32>} : memref<16x32xf32, #tpu.memory_space<vmem>>, vector<2x32xf32>,
    %c1_i32 = arith.constant 1 : i32
    %c2_i32_15 = arith.constant 2 : i32
    %40 = arith.muli %c1_i32, %c2_i32_15 : i32
    %41 = tpu.assume_multiple %40, 2 : i32
    %42 = arith.index_cast %41 : i32 to index
    %c0_16 = arith.constant 0 : index
    %43 = vector.load %arg11[%42, %c0_16] : memref<16x128xf32, #tpu.memory_space<vmem>>, vector<2x128xf32>
    %cst_17 = arith.constant dense<0.000000e+00> : vector<2x128xf32>
    %44 = tpu.matmul %37, %13, %cst_17 {dimension_numbers = #tpu.dot_dimension_numbers<[1], [0], [0], [1], [0, 0, 1, 1], [], []>} : vector<2x32xf32>, vector<32x128xf32>, vector<2x128xf32> -> vector<2x128xf32>
    %45 = arith.addf %43, %44 : vector<2x128xf32>
    %46 = math.tanh %45 : vector<2x128xf32>
    %47 = arith.negf %45 : vector<2x128xf32>
    %48 = math.exp %47 : vector<2x128xf32>
    %cst_18 = arith.constant 1.000000e+00 : f32
    %49 = vector.broadcast %cst_18 : f32 to vector<2x128xf32>
    %50 = arith.addf %49, %48 : vector<2x128xf32>
    %51 = arith.divf %49, %50 : vector<2x128xf32>
    %52 = arith.select %5, %46, %51 : vector<2x128xi1>, vector<2x128xf32>
    %53 = vector.extract_strided_slice %52 {offsets = [0, 0], sizes = [2, 32], strides = [1, 1]} : vector<2x128xf32> to vector<2x32xf32>
    %54 = vector.extract_strided_slice %52 {offsets = [0, 32], sizes = [2, 32], strides = [1, 1]} : vector<2x128xf32> to vector<2x32xf32>
    %55 = vector.extract_strided_slice %52 {offsets = [0, 64], sizes = [2, 32], strides = [1, 1]} : vector<2x128xf32> to vector<2x32xf32>
    %56 = vector.extract_strided_slice %52 {offsets = [0, 96], sizes = [2, 32], strides = [1, 1]} : vector<2x128xf32> to vector<2x32xf32>
    %57 = arith.mulf %54, %35 : vector<2x32xf32>
    %58 = arith.mulf %53, %55 : vector<2x32xf32>
    %59 = arith.addf %57, %58 : vector<2x32xf32>
    %60 = math.tanh %59 : vector<2x32xf32>
    %61 = arith.mulf %56, %60 : vector<2x32xf32>
    %62 = arith.index_cast %41 : i32 to index
    %c0_19 = arith.constant 0 : index
    %63 = vector.load %arg8[%62, %c0_19] : memref<16x32xf32, #tpu.memory_space<vmem>>, vector<2x32xf32>
    tpu.vector_store %arg8[%62, %c0_19], %61 {strides = array<i32>} : memref<16x32xf32, #tpu.memory_space<vmem>>, vector<2x32xf32>,
    %c2_i32_20 = arith.constant 2 : i32
    %c2_i32_21 = arith.constant 2 : i32
    %64 = arith.muli %c2_i32_20, %c2_i32_21 : i32
    %65 = tpu.assume_multiple %64, 2 : i32
    %66 = arith.index_cast %65 : i32 to index
    %c0_22 = arith.constant 0 : index
    %67 = vector.load %arg11[%66, %c0_22] : memref<16x128xf32, #tpu.memory_space<vmem>>, vector<2x128xf32>
    %cst_23 = arith.constant dense<0.000000e+00> : vector<2x128xf32>
    %68 = tpu.matmul %61, %13, %cst_23 {dimension_numbers = #tpu.dot_dimension_numbers<[1], [0], [0], [1], [0, 0, 1, 1], [], []>} : vector<2x32xf32>, vector<32x128xf32>, vector<2x128xf32> -> vector<2x128xf32>
    %69 = arith.addf %67, %68 : vector<2x128xf32>
    %70 = math.tanh %69 : vector<2x128xf32>
    %71 = arith.negf %69 : vector<2x128xf32>
    %72 = math.exp %71 : vector<2x128xf32>
    %cst_24 = arith.constant 1.000000e+00 : f32
    %73 = vector.broadcast %cst_24 : f32 to vector<2x128xf32>
    %74 = arith.addf %73, %72 : vector<2x128xf32>
    %75 = arith.divf %73, %74 : vector<2x128xf32>
    %76 = arith.select %5, %70, %75 : vector<2x128xi1>, vector<2x128xf32>
    %77 = vector.extract_strided_slice %76 {offsets = [0, 0], sizes = [2, 32], strides = [1, 1]} : vector<2x128xf32> to vector<2x32xf32>
    %78 = vector.extract_strided_slice %76 {offsets = [0, 32], sizes = [2, 32], strides = [1, 1]} : vector<2x128xf32> to vector<2x32xf32>
    %79 = vector.extract_strided_slice %76 {offsets = [0, 64], sizes = [2, 32], strides = [1, 1]} : vector<2x128xf32> to vector<2x32xf32>
    %80 = vector.extract_strided_slice %76 {offsets = [0, 96], sizes = [2, 32], strides = [1, 1]} : vector<2x128xf32> to vector<2x32xf32>
    %81 = arith.mulf %78, %59 : vector<2x32xf32>
    %82 = arith.mulf %77, %79 : vector<2x32xf32>
    %83 = arith.addf %81, %82 : vector<2x32xf32>
    %84 = math.tanh %83 : vector<2x32xf32>
    %85 = arith.mulf %80, %84 : vector<2x32xf32>
    %86 = arith.index_cast %65 : i32 to index
    %c0_25 = arith.constant 0 : index
    %87 = vector.load %arg8[%86, %c0_25] : memref<16x32xf32, #tpu.memory_space<vmem>>, vector<2x32xf32>
    tpu.vector_store %arg8[%86, %c0_25], %85 {strides = array<i32>} : memref<16x32xf32, #tpu.memory_space<vmem>>, vector<2x32xf32>,
    %c3_i32 = arith.constant 3 : i32
    %c2_i32_26 = arith.constant 2 : i32
    %88 = arith.muli %c3_i32, %c2_i32_26 : i32
    %89 = tpu.assume_multiple %88, 2 : i32
    %90 = arith.index_cast %89 : i32 to index
    %c0_27 = arith.constant 0 : index
    %91 = vector.load %arg11[%90, %c0_27] : memref<16x128xf32, #tpu.memory_space<vmem>>, vector<2x128xf32>
    %cst_28 = arith.constant dense<0.000000e+00> : vector<2x128xf32>
    %92 = tpu.matmul %85, %13, %cst_28 {dimension_numbers = #tpu.dot_dimension_numbers<[1], [0], [0], [1], [0, 0, 1, 1], [], []>} : vector<2x32xf32>, vector<32x128xf32>, vector<2x128xf32> -> vector<2x128xf32>
    %93 = arith.addf %91, %92 : vector<2x128xf32>
    %94 = math.tanh %93 : vector<2x128xf32>
    %95 = arith.negf %93 : vector<2x128xf32>
    %96 = math.exp %95 : vector<2x128xf32>
    %cst_29 = arith.constant 1.000000e+00 : f32
    %97 = vector.broadcast %cst_29 : f32 to vector<2x128xf32>
    %98 = arith.addf %97, %96 : vector<2x128xf32>
    %99 = arith.divf %97, %98 : vector<2x128xf32>
    %100 = arith.select %5, %94, %99 : vector<2x128xi1>, vector<2x128xf32>
    %101 = vector.extract_strided_slice %100 {offsets = [0, 0], sizes = [2, 32], strides = [1, 1]} : vector<2x128xf32> to vector<2x32xf32>
    %102 = vector.extract_strided_slice %100 {offsets = [0, 32], sizes = [2, 32], strides = [1, 1]} : vector<2x128xf32> to vector<2x32xf32>
    %103 = vector.extract_strided_slice %100 {offsets = [0, 64], sizes = [2, 32], strides = [1, 1]} : vector<2x128xf32> to vector<2x32xf32>
    %104 = vector.extract_strided_slice %100 {offsets = [0, 96], sizes = [2, 32], strides = [1, 1]} : vector<2x128xf32> to vector<2x32xf32>
    %105 = arith.mulf %102, %83 : vector<2x32xf32>
    %106 = arith.mulf %101, %103 : vector<2x32xf32>
    %107 = arith.addf %105, %106 : vector<2x32xf32>
    %108 = math.tanh %107 : vector<2x32xf32>
    %109 = arith.mulf %104, %108 : vector<2x32xf32>
    %110 = arith.index_cast %89 : i32 to index
    %c0_30 = arith.constant 0 : index
    %111 = vector.load %arg8[%110, %c0_30] : memref<16x32xf32, #tpu.memory_space<vmem>>, vector<2x32xf32>
    tpu.vector_store %arg8[%110, %c0_30], %109 {strides = array<i32>} : memref<16x32xf32, #tpu.memory_space<vmem>>, vector<2x32xf32>,
    %c4_i32 = arith.constant 4 : i32
    %c2_i32_31 = arith.constant 2 : i32
    %112 = arith.muli %c4_i32, %c2_i32_31 : i32
    %113 = tpu.assume_multiple %112, 2 : i32
    %114 = arith.index_cast %113 : i32 to index
    %c0_32 = arith.constant 0 : index
    %115 = vector.load %arg11[%114, %c0_32] : memref<16x128xf32, #tpu.memory_space<vmem>>, vector<2x128xf32>
    %cst_33 = arith.constant dense<0.000000e+00> : vector<2x128xf32>
    %116 = tpu.matmul %109, %13, %cst_33 {dimension_numbers = #tpu.dot_dimension_numbers<[1], [0], [0], [1], [0, 0, 1, 1], [], []>} : vector<2x32xf32>, vector<32x128xf32>, vector<2x128xf32> -> vector<2x128xf32>
    %117 = arith.addf %115, %116 : vector<2x128xf32>
    %118 = math.tanh %117 : vector<2x128xf32>
    %119 = arith.negf %117 : vector<2x128xf32>
    %120 = math.exp %119 : vector<2x128xf32>
    %cst_34 = arith.constant 1.000000e+00 : f32
    %121 = vector.broadcast %cst_34 : f32 to vector<2x128xf32>
    %122 = arith.addf %121, %120 : vector<2x128xf32>
    %123 = arith.divf %121, %122 : vector<2x128xf32>
    %124 = arith.select %5, %118, %123 : vector<2x128xi1>, vector<2x128xf32>
    %125 = vector.extract_strided_slice %124 {offsets = [0, 0], sizes = [2, 32], strides = [1, 1]} : vector<2x128xf32> to vector<2x32xf32>
    %126 = vector.extract_strided_slice %124 {offsets = [0, 32], sizes = [2, 32], strides = [1, 1]} : vector<2x128xf32> to vector<2x32xf32>
    %127 = vector.extract_strided_slice %124 {offsets = [0, 64], sizes = [2, 32], strides = [1, 1]} : vector<2x128xf32> to vector<2x32xf32>
    %128 = vector.extract_strided_slice %124 {offsets = [0, 96], sizes = [2, 32], strides = [1, 1]} : vector<2x128xf32> to vector<2x32xf32>
    %129 = arith.mulf %126, %107 : vector<2x32xf32>
    %130 = arith.mulf %125, %127 : vector<2x32xf32>
    %131 = arith.addf %129, %130 : vector<2x32xf32>
    %132 = math.tanh %131 : vector<2x32xf32>
    %133 = arith.mulf %128, %132 : vector<2x32xf32>
    %134 = arith.index_cast %113 : i32 to index
    %c0_35 = arith.constant 0 : index
    %135 = vector.load %arg8[%134, %c0_35] : memref<16x32xf32, #tpu.memory_space<vmem>>, vector<2x32xf32>
    tpu.vector_store %arg8[%134, %c0_35], %133 {strides = array<i32>} : memref<16x32xf32, #tpu.memory_space<vmem>>, vector<2x32xf32>,
    %c5_i32 = arith.constant 5 : i32
    %c2_i32_36 = arith.constant 2 : i32
    %136 = arith.muli %c5_i32, %c2_i32_36 : i32
    %137 = tpu.assume_multiple %136, 2 : i32
    %138 = arith.index_cast %137 : i32 to index
    %c0_37 = arith.constant 0 : index
    %139 = vector.load %arg11[%138, %c0_37] : memref<16x128xf32, #tpu.memory_space<vmem>>, vector<2x128xf32>
    %cst_38 = arith.constant dense<0.000000e+00> : vector<2x128xf32>
    %140 = tpu.matmul %133, %13, %cst_38 {dimension_numbers = #tpu.dot_dimension_numbers<[1], [0], [0], [1], [0, 0, 1, 1], [], []>} : vector<2x32xf32>, vector<32x128xf32>, vector<2x128xf32> -> vector<2x128xf32>
    %141 = arith.addf %139, %140 : vector<2x128xf32>
    %142 = math.tanh %141 : vector<2x128xf32>
    %143 = arith.negf %141 : vector<2x128xf32>
    %144 = math.exp %143 : vector<2x128xf32>
    %cst_39 = arith.constant 1.000000e+00 : f32
    %145 = vector.broadcast %cst_39 : f32 to vector<2x128xf32>
    %146 = arith.addf %145, %144 : vector<2x128xf32>
    %147 = arith.divf %145, %146 : vector<2x128xf32>
    %148 = arith.select %5, %142, %147 : vector<2x128xi1>, vector<2x128xf32>
    %149 = vector.extract_strided_slice %148 {offsets = [0, 0], sizes = [2, 32], strides = [1, 1]} : vector<2x128xf32> to vector<2x32xf32>
    %150 = vector.extract_strided_slice %148 {offsets = [0, 32], sizes = [2, 32], strides = [1, 1]} : vector<2x128xf32> to vector<2x32xf32>
    %151 = vector.extract_strided_slice %148 {offsets = [0, 64], sizes = [2, 32], strides = [1, 1]} : vector<2x128xf32> to vector<2x32xf32>
    %152 = vector.extract_strided_slice %148 {offsets = [0, 96], sizes = [2, 32], strides = [1, 1]} : vector<2x128xf32> to vector<2x32xf32>
    %153 = arith.mulf %150, %131 : vector<2x32xf32>
    %154 = arith.mulf %149, %151 : vector<2x32xf32>
    %155 = arith.addf %153, %154 : vector<2x32xf32>
    %156 = math.tanh %155 : vector<2x32xf32>
    %157 = arith.mulf %152, %156 : vector<2x32xf32>
    %158 = arith.index_cast %137 : i32 to index
    %c0_40 = arith.constant 0 : index
    %159 = vector.load %arg8[%158, %c0_40] : memref<16x32xf32, #tpu.memory_space<vmem>>, vector<2x32xf32>
    tpu.vector_store %arg8[%158, %c0_40], %157 {strides = array<i32>} : memref<16x32xf32, #tpu.memory_space<vmem>>, vector<2x32xf32>,
    %c6_i32 = arith.constant 6 : i32
    %c2_i32_41 = arith.constant 2 : i32
    %160 = arith.muli %c6_i32, %c2_i32_41 : i32
    %161 = tpu.assume_multiple %160, 2 : i32
    %162 = arith.index_cast %161 : i32 to index
    %c0_42 = arith.constant 0 : index
    %163 = vector.load %arg11[%162, %c0_42] : memref<16x128xf32, #tpu.memory_space<vmem>>, vector<2x128xf32>
    %cst_43 = arith.constant dense<0.000000e+00> : vector<2x128xf32>
    %164 = tpu.matmul %157, %13, %cst_43 {dimension_numbers = #tpu.dot_dimension_numbers<[1], [0], [0], [1], [0, 0, 1, 1], [], []>} : vector<2x32xf32>, vector<32x128xf32>, vector<2x128xf32> -> vector<2x128xf32>
    %165 = arith.addf %163, %164 : vector<2x128xf32>
    %166 = math.tanh %165 : vector<2x128xf32>
    %167 = arith.negf %165 : vector<2x128xf32>
    %168 = math.exp %167 : vector<2x128xf32>
    %cst_44 = arith.constant 1.000000e+00 : f32
    %169 = vector.broadcast %cst_44 : f32 to vector<2x128xf32>
    %170 = arith.addf %169, %168 : vector<2x128xf32>
    %171 = arith.divf %169, %170 : vector<2x128xf32>
    %172 = arith.select %5, %166, %171 : vector<2x128xi1>, vector<2x128xf32>
    %173 = vector.extract_strided_slice %172 {offsets = [0, 0], sizes = [2, 32], strides = [1, 1]} : vector<2x128xf32> to vector<2x32xf32>
    %174 = vector.extract_strided_slice %172 {offsets = [0, 32], sizes = [2, 32], strides = [1, 1]} : vector<2x128xf32> to vector<2x32xf32>
    %175 = vector.extract_strided_slice %172 {offsets = [0, 64], sizes = [2, 32], strides = [1, 1]} : vector<2x128xf32> to vector<2x32xf32>
    %176 = vector.extract_strided_slice %172 {offsets = [0, 96], sizes = [2, 32], strides = [1, 1]} : vector<2x128xf32> to vector<2x32xf32>
    %177 = arith.mulf %174, %155 : vector<2x32xf32>
    %178 = arith.mulf %173, %175 : vector<2x32xf32>
    %179 = arith.addf %177, %178 : vector<2x32xf32>
    %180 = math.tanh %179 : vector<2x32xf32>
    %181 = arith.mulf %176, %180 : vector<2x32xf32>
    %182 = arith.index_cast %161 : i32 to index
    %c0_45 = arith.constant 0 : index
    %183 = vector.load %arg8[%182, %c0_45] : memref<16x32xf32, #tpu.memory_space<vmem>>, vector<2x32xf32>
    tpu.vector_store %arg8[%182, %c0_45], %181 {strides = array<i32>} : memref<16x32xf32, #tpu.memory_space<vmem>>, vector<2x32xf32>,
    %c7_i32 = arith.constant 7 : i32
    %c2_i32_46 = arith.constant 2 : i32
    %184 = arith.muli %c7_i32, %c2_i32_46 : i32
    %185 = tpu.assume_multiple %184, 2 : i32
    %186 = arith.index_cast %185 : i32 to index
    %c0_47 = arith.constant 0 : index
    %187 = vector.load %arg11[%186, %c0_47] : memref<16x128xf32, #tpu.memory_space<vmem>>, vector<2x128xf32>
    %cst_48 = arith.constant dense<0.000000e+00> : vector<2x128xf32>
    %188 = tpu.matmul %181, %13, %cst_48 {dimension_numbers = #tpu.dot_dimension_numbers<[1], [0], [0], [1], [0, 0, 1, 1], [], []>} : vector<2x32xf32>, vector<32x128xf32>, vector<2x128xf32> -> vector<2x128xf32>
    %189 = arith.addf %187, %188 : vector<2x128xf32>
    %190 = math.tanh %189 : vector<2x128xf32>
    %191 = arith.negf %189 : vector<2x128xf32>
    %192 = math.exp %191 : vector<2x128xf32>
    %cst_49 = arith.constant 1.000000e+00 : f32
    %193 = vector.broadcast %cst_49 : f32 to vector<2x128xf32>
    %194 = arith.addf %193, %192 : vector<2x128xf32>
    %195 = arith.divf %193, %194 : vector<2x128xf32>
    %196 = arith.select %5, %190, %195 : vector<2x128xi1>, vector<2x128xf32>
    %197 = vector.extract_strided_slice %196 {offsets = [0, 0], sizes = [2, 32], strides = [1, 1]} : vector<2x128xf32> to vector<2x32xf32>
    %198 = vector.extract_strided_slice %196 {offsets = [0, 32], sizes = [2, 32], strides = [1, 1]} : vector<2x128xf32> to vector<2x32xf32>
    %199 = vector.extract_strided_slice %196 {offsets = [0, 64], sizes = [2, 32], strides = [1, 1]} : vector<2x128xf32> to vector<2x32xf32>
    %200 = vector.extract_strided_slice %196 {offsets = [0, 96], sizes = [2, 32], strides = [1, 1]} : vector<2x128xf32> to vector<2x32xf32>
    %201 = arith.mulf %198, %179 : vector<2x32xf32>
    %202 = arith.mulf %197, %199 : vector<2x32xf32>
    %203 = arith.addf %201, %202 : vector<2x32xf32>
    %204 = math.tanh %203 : vector<2x32xf32>
    %205 = arith.mulf %200, %204 : vector<2x32xf32>
    %206 = arith.index_cast %185 : i32 to index
    %c0_50 = arith.constant 0 : index
    %207 = vector.load %arg8[%206, %c0_50] : memref<16x32xf32, #tpu.memory_space<vmem>>, vector<2x32xf32>
    tpu.vector_store %arg8[%206, %c0_50], %205 {strides = array<i32>} : memref<16x32xf32, #tpu.memory_space<vmem>>, vector<2x32xf32>,
    %c8_i32 = arith.constant 8 : i32
    %c0_51 = arith.constant 0 : index
    %c0_52 = arith.constant 0 : index
    %c0_53 = arith.constant 0 : index
    %208 = vector.load %arg9[%c0_51, %c0_52, %c0_53] : memref<2x2x32xf32, #tpu.memory_space<vmem>>, vector<1x2x32xf32>
    %209 = vector.shape_cast %208 : vector<1x2x32xf32> to vector<2x32xf32>
    %210 = vector.shape_cast %205 : vector<2x32xf32> to vector<1x2x32xf32>
    tpu.vector_store %arg9[%c0_51, %c0_52, %c0_53], %210 {strides = array<i32>} : memref<2x2x32xf32, #tpu.memory_space<vmem>>, vector<1x2x32xf32>,
    %c0_54 = arith.constant 0 : index
    %c0_55 = arith.constant 0 : index
    %c0_56 = arith.constant 0 : index
    %211 = vector.load %arg10[%c0_54, %c0_55, %c0_56] : memref<2x2x32xf32, #tpu.memory_space<vmem>>, vector<1x2x32xf32>
    %212 = vector.shape_cast %211 : vector<1x2x32xf32> to vector<2x32xf32>
    %213 = vector.shape_cast %203 : vector<2x32xf32> to vector<1x2x32xf32>
    tpu.vector_store %arg10[%c0_54, %c0_55, %c0_56], %213 {strides = array<i32>} : memref<2x2x32xf32, #tpu.memory_space<vmem>>, vector<1x2x32xf32>,
    %c0_57 = arith.constant 0 : index
    %c0_58 = arith.constant 0 : index
    %214 = vector.load %arg8[%c0_57, %c0_58] : memref<16x32xf32, #tpu.memory_space<vmem>>, vector<16x32xf32>
    %c0_59 = arith.constant 0 : index
    %c0_60 = arith.constant 0 : index
    %215 = vector.load %arg5[%c0_59, %c0_60] : memref<32x128xf32, #tpu.memory_space<vmem>>, vector<32x128xf32>
    %cst_61 = arith.constant dense<0.000000e+00> : vector<16x128xf32>
    %216 = tpu.matmul %214, %215, %cst_61 {dimension_numbers = #tpu.dot_dimension_numbers<[1], [0], [0], [1], [0, 0, 1, 1], [], []>} : vector<16x32xf32>, vector<32x128xf32>, vector<16x128xf32> -> vector<16x128xf32>
    %c0_62 = arith.constant 0 : index
    %c0_63 = arith.constant 0 : index
    %217 = vector.load %arg7[%c0_62, %c0_63] : memref<1x128xf32, #tpu.memory_space<vmem>>, vector<1x128xf32>
    %218 = vector.broadcast %217 : vector<1x128xf32> to vector<16x128xf32>
    %219 = arith.addf %216, %218 : vector<16x128xf32>
    %c0_64 = arith.constant 0 : index
    %c0_65 = arith.constant 0 : index
    %220 = vector.load %arg11[%c0_64, %c0_65] : memref<16x128xf32, #tpu.memory_space<vmem>>, vector<16x128xf32>
    tpu.vector_store %arg11[%c0_64, %c0_65], %219 {strides = array<i32>} : memref<16x128xf32, #tpu.memory_space<vmem>>, vector<16x128xf32>,
    %c0_66 = arith.constant 0 : index
    %c0_67 = arith.constant 0 : index
    %221 = vector.load %arg6[%c0_66, %c0_67] : memref<32x128xf32, #tpu.memory_space<vmem>>, vector<32x128xf32>
    %cst_68 = arith.constant 0.000000e+00 : f32
    %222 = vector.broadcast %cst_68 : f32 to vector<2x32xf32>
    %cst_69 = arith.constant 0.000000e+00 : f32
    %223 = vector.broadcast %cst_69 : f32 to vector<2x32xf32>
    %c0_i32_70 = arith.constant 0 : i32
    %c2_i32_71 = arith.constant 2 : i32
    %224 = arith.muli %c0_i32_70, %c2_i32_71 : i32
    %225 = tpu.assume_multiple %224, 2 : i32
    %226 = arith.index_cast %225 : i32 to index
    %c0_72 = arith.constant 0 : index
    %227 = vector.load %arg11[%226, %c0_72] : memref<16x128xf32, #tpu.memory_space<vmem>>, vector<2x128xf32>
    %cst_73 = arith.constant dense<0.000000e+00> : vector<2x128xf32>
    %228 = tpu.matmul %222, %221, %cst_73 {dimension_numbers = #tpu.dot_dimension_numbers<[1], [0], [0], [1], [0, 0, 1, 1], [], []>} : vector<2x32xf32>, vector<32x128xf32>, vector<2x128xf32> -> vector<2x128xf32>
    %229 = arith.addf %227, %228 : vector<2x128xf32>
    %230 = math.tanh %229 : vector<2x128xf32>
    %231 = arith.negf %229 : vector<2x128xf32>
    %232 = math.exp %231 : vector<2x128xf32>
    %cst_74 = arith.constant 1.000000e+00 : f32
    %233 = vector.broadcast %cst_74 : f32 to vector<2x128xf32>
    %234 = arith.addf %233, %232 : vector<2x128xf32>
    %235 = arith.divf %233, %234 : vector<2x128xf32>
    %236 = arith.select %5, %230, %235 : vector<2x128xi1>, vector<2x128xf32>
    %237 = vector.extract_strided_slice %236 {offsets = [0, 0], sizes = [2, 32], strides = [1, 1]} : vector<2x128xf32> to vector<2x32xf32>
    %238 = vector.extract_strided_slice %236 {offsets = [0, 32], sizes = [2, 32], strides = [1, 1]} : vector<2x128xf32> to vector<2x32xf32>
    %239 = vector.extract_strided_slice %236 {offsets = [0, 64], sizes = [2, 32], strides = [1, 1]} : vector<2x128xf32> to vector<2x32xf32>
    %240 = vector.extract_strided_slice %236 {offsets = [0, 96], sizes = [2, 32], strides = [1, 1]} : vector<2x128xf32> to vector<2x32xf32>
    %241 = arith.mulf %238, %223 : vector<2x32xf32>
    %242 = arith.mulf %237, %239 : vector<2x32xf32>
    %243 = arith.addf %241, %242 : vector<2x32xf32>
    %244 = math.tanh %243 : vector<2x32xf32>
    %245 = arith.mulf %240, %244 : vector<2x32xf32>
    %246 = arith.index_cast %225 : i32 to index
    %c0_75 = arith.constant 0 : index
    %247 = vector.load %arg8[%246, %c0_75] : memref<16x32xf32, #tpu.memory_space<vmem>>, vector<2x32xf32>
    tpu.vector_store %arg8[%246, %c0_75], %245 {strides = array<i32>} : memref<16x32xf32, #tpu.memory_space<vmem>>, vector<2x32xf32>,
    %c1_i32_76 = arith.constant 1 : i32
    %c2_i32_77 = arith.constant 2 : i32
    %248 = arith.muli %c1_i32_76, %c2_i32_77 : i32
    %249 = tpu.assume_multiple %248, 2 : i32
    %250 = arith.index_cast %249 : i32 to index
    %c0_78 = arith.constant 0 : index
    %251 = vector.load %arg11[%250, %c0_78] : memref<16x128xf32, #tpu.memory_space<vmem>>, vector<2x128xf32>
    %cst_79 = arith.constant dense<0.000000e+00> : vector<2x128xf32>
    %252 = tpu.matmul %245, %221, %cst_79 {dimension_numbers = #tpu.dot_dimension_numbers<[1], [0], [0], [1], [0, 0, 1, 1], [], []>} : vector<2x32xf32>, vector<32x128xf32>, vector<2x128xf32> -> vector<2x128xf32>
    %253 = arith.addf %251, %252 : vector<2x128xf32>
    %254 = math.tanh %253 : vector<2x128xf32>
    %255 = arith.negf %253 : vector<2x128xf32>
    %256 = math.exp %255 : vector<2x128xf32>
    %cst_80 = arith.constant 1.000000e+00 : f32
    %257 = vector.broadcast %cst_80 : f32 to vector<2x128xf32>
    %258 = arith.addf %257, %256 : vector<2x128xf32>
    %259 = arith.divf %257, %258 : vector<2x128xf32>
    %260 = arith.select %5, %254, %259 : vector<2x128xi1>, vector<2x128xf32>
    %261 = vector.extract_strided_slice %260 {offsets = [0, 0], sizes = [2, 32], strides = [1, 1]} : vector<2x128xf32> to vector<2x32xf32>
    %262 = vector.extract_strided_slice %260 {offsets = [0, 32], sizes = [2, 32], strides = [1, 1]} : vector<2x128xf32> to vector<2x32xf32>
    %263 = vector.extract_strided_slice %260 {offsets = [0, 64], sizes = [2, 32], strides = [1, 1]} : vector<2x128xf32> to vector<2x32xf32>
    %264 = vector.extract_strided_slice %260 {offsets = [0, 96], sizes = [2, 32], strides = [1, 1]} : vector<2x128xf32> to vector<2x32xf32>
    %265 = arith.mulf %262, %243 : vector<2x32xf32>
    %266 = arith.mulf %261, %263 : vector<2x32xf32>
    %267 = arith.addf %265, %266 : vector<2x32xf32>
    %268 = math.tanh %267 : vector<2x32xf32>
    %269 = arith.mulf %264, %268 : vector<2x32xf32>
    %270 = arith.index_cast %249 : i32 to index
    %c0_81 = arith.constant 0 : index
    %271 = vector.load %arg8[%270, %c0_81] : memref<16x32xf32, #tpu.memory_space<vmem>>, vector<2x32xf32>
    tpu.vector_store %arg8[%270, %c0_81], %269 {strides = array<i32>} : memref<16x32xf32, #tpu.memory_space<vmem>>, vector<2x32xf32>,
    %c2_i32_82 = arith.constant 2 : i32
    %c2_i32_83 = arith.constant 2 : i32
    %272 = arith.muli %c2_i32_82, %c2_i32_83 : i32
    %273 = tpu.assume_multiple %272, 2 : i32
    %274 = arith.index_cast %273 : i32 to index
    %c0_84 = arith.constant 0 : index
    %275 = vector.load %arg11[%274, %c0_84] : memref<16x128xf32, #tpu.memory_space<vmem>>, vector<2x128xf32>
    %cst_85 = arith.constant dense<0.000000e+00> : vector<2x128xf32>
    %276 = tpu.matmul %269, %221, %cst_85 {dimension_numbers = #tpu.dot_dimension_numbers<[1], [0], [0], [1], [0, 0, 1, 1], [], []>} : vector<2x32xf32>, vector<32x128xf32>, vector<2x128xf32> -> vector<2x128xf32>
    %277 = arith.addf %275, %276 : vector<2x128xf32>
    %278 = math.tanh %277 : vector<2x128xf32>
    %279 = arith.negf %277 : vector<2x128xf32>
    %280 = math.exp %279 : vector<2x128xf32>
    %cst_86 = arith.constant 1.000000e+00 : f32
    %281 = vector.broadcast %cst_86 : f32 to vector<2x128xf32>
    %282 = arith.addf %281, %280 : vector<2x128xf32>
    %283 = arith.divf %281, %282 : vector<2x128xf32>
    %284 = arith.select %5, %278, %283 : vector<2x128xi1>, vector<2x128xf32>
    %285 = vector.extract_strided_slice %284 {offsets = [0, 0], sizes = [2, 32], strides = [1, 1]} : vector<2x128xf32> to vector<2x32xf32>
    %286 = vector.extract_strided_slice %284 {offsets = [0, 32], sizes = [2, 32], strides = [1, 1]} : vector<2x128xf32> to vector<2x32xf32>
    %287 = vector.extract_strided_slice %284 {offsets = [0, 64], sizes = [2, 32], strides = [1, 1]} : vector<2x128xf32> to vector<2x32xf32>
    %288 = vector.extract_strided_slice %284 {offsets = [0, 96], sizes = [2, 32], strides = [1, 1]} : vector<2x128xf32> to vector<2x32xf32>
    %289 = arith.mulf %286, %267 : vector<2x32xf32>
    %290 = arith.mulf %285, %287 : vector<2x32xf32>
    %291 = arith.addf %289, %290 : vector<2x32xf32>
    %292 = math.tanh %291 : vector<2x32xf32>
    %293 = arith.mulf %288, %292 : vector<2x32xf32>
    %294 = arith.index_cast %273 : i32 to index
    %c0_87 = arith.constant 0 : index
    %295 = vector.load %arg8[%294, %c0_87] : memref<16x32xf32, #tpu.memory_space<vmem>>, vector<2x32xf32>
    tpu.vector_store %arg8[%294, %c0_87], %293 {strides = array<i32>} : memref<16x32xf32, #tpu.memory_space<vmem>>, vector<2x32xf32>,
    %c3_i32_88 = arith.constant 3 : i32
    %c2_i32_89 = arith.constant 2 : i32
    %296 = arith.muli %c3_i32_88, %c2_i32_89 : i32
    %297 = tpu.assume_multiple %296, 2 : i32
    %298 = arith.index_cast %297 : i32 to index
    %c0_90 = arith.constant 0 : index
    %299 = vector.load %arg11[%298, %c0_90] : memref<16x128xf32, #tpu.memory_space<vmem>>, vector<2x128xf32>
    %cst_91 = arith.constant dense<0.000000e+00> : vector<2x128xf32>
    %300 = tpu.matmul %293, %221, %cst_91 {dimension_numbers = #tpu.dot_dimension_numbers<[1], [0], [0], [1], [0, 0, 1, 1], [], []>} : vector<2x32xf32>, vector<32x128xf32>, vector<2x128xf32> -> vector<2x128xf32>
    %301 = arith.addf %299, %300 : vector<2x128xf32>
    %302 = math.tanh %301 : vector<2x128xf32>
    %303 = arith.negf %301 : vector<2x128xf32>
    %304 = math.exp %303 : vector<2x128xf32>
    %cst_92 = arith.constant 1.000000e+00 : f32
    %305 = vector.broadcast %cst_92 : f32 to vector<2x128xf32>
    %306 = arith.addf %305, %304 : vector<2x128xf32>
    %307 = arith.divf %305, %306 : vector<2x128xf32>
    %308 = arith.select %5, %302, %307 : vector<2x128xi1>, vector<2x128xf32>
    %309 = vector.extract_strided_slice %308 {offsets = [0, 0], sizes = [2, 32], strides = [1, 1]} : vector<2x128xf32> to vector<2x32xf32>
    %310 = vector.extract_strided_slice %308 {offsets = [0, 32], sizes = [2, 32], strides = [1, 1]} : vector<2x128xf32> to vector<2x32xf32>
    %311 = vector.extract_strided_slice %308 {offsets = [0, 64], sizes = [2, 32], strides = [1, 1]} : vector<2x128xf32> to vector<2x32xf32>
    %312 = vector.extract_strided_slice %308 {offsets = [0, 96], sizes = [2, 32], strides = [1, 1]} : vector<2x128xf32> to vector<2x32xf32>
    %313 = arith.mulf %310, %291 : vector<2x32xf32>
    %314 = arith.mulf %309, %311 : vector<2x32xf32>
    %315 = arith.addf %313, %314 : vector<2x32xf32>
    %316 = math.tanh %315 : vector<2x32xf32>
    %317 = arith.mulf %312, %316 : vector<2x32xf32>
    %318 = arith.index_cast %297 : i32 to index
    %c0_93 = arith.constant 0 : index
    %319 = vector.load %arg8[%318, %c0_93] : memref<16x32xf32, #tpu.memory_space<vmem>>, vector<2x32xf32>
    tpu.vector_store %arg8[%318, %c0_93], %317 {strides = array<i32>} : memref<16x32xf32, #tpu.memory_space<vmem>>, vector<2x32xf32>,
    %c4_i32_94 = arith.constant 4 : i32
    %c2_i32_95 = arith.constant 2 : i32
    %320 = arith.muli %c4_i32_94, %c2_i32_95 : i32
    %321 = tpu.assume_multiple %320, 2 : i32
    %322 = arith.index_cast %321 : i32 to index
    %c0_96 = arith.constant 0 : index
    %323 = vector.load %arg11[%322, %c0_96] : memref<16x128xf32, #tpu.memory_space<vmem>>, vector<2x128xf32>
    %cst_97 = arith.constant dense<0.000000e+00> : vector<2x128xf32>
    %324 = tpu.matmul %317, %221, %cst_97 {dimension_numbers = #tpu.dot_dimension_numbers<[1], [0], [0], [1], [0, 0, 1, 1], [], []>} : vector<2x32xf32>, vector<32x128xf32>, vector<2x128xf32> -> vector<2x128xf32>
    %325 = arith.addf %323, %324 : vector<2x128xf32>
    %326 = math.tanh %325 : vector<2x128xf32>
    %327 = arith.negf %325 : vector<2x128xf32>
    %328 = math.exp %327 : vector<2x128xf32>
    %cst_98 = arith.constant 1.000000e+00 : f32
    %329 = vector.broadcast %cst_98 : f32 to vector<2x128xf32>
    %330 = arith.addf %329, %328 : vector<2x128xf32>
    %331 = arith.divf %329, %330 : vector<2x128xf32>
    %332 = arith.select %5, %326, %331 : vector<2x128xi1>, vector<2x128xf32>
    %333 = vector.extract_strided_slice %332 {offsets = [0, 0], sizes = [2, 32], strides = [1, 1]} : vector<2x128xf32> to vector<2x32xf32>
    %334 = vector.extract_strided_slice %332 {offsets = [0, 32], sizes = [2, 32], strides = [1, 1]} : vector<2x128xf32> to vector<2x32xf32>
    %335 = vector.extract_strided_slice %332 {offsets = [0, 64], sizes = [2, 32], strides = [1, 1]} : vector<2x128xf32> to vector<2x32xf32>
    %336 = vector.extract_strided_slice %332 {offsets = [0, 96], sizes = [2, 32], strides = [1, 1]} : vector<2x128xf32> to vector<2x32xf32>
    %337 = arith.mulf %334, %315 : vector<2x32xf32>
    %338 = arith.mulf %333, %335 : vector<2x32xf32>
    %339 = arith.addf %337, %338 : vector<2x32xf32>
    %340 = math.tanh %339 : vector<2x32xf32>
    %341 = arith.mulf %336, %340 : vector<2x32xf32>
    %342 = arith.index_cast %321 : i32 to index
    %c0_99 = arith.constant 0 : index
    %343 = vector.load %arg8[%342, %c0_99] : memref<16x32xf32, #tpu.memory_space<vmem>>, vector<2x32xf32>
    tpu.vector_store %arg8[%342, %c0_99], %341 {strides = array<i32>} : memref<16x32xf32, #tpu.memory_space<vmem>>, vector<2x32xf32>,
    %c5_i32_100 = arith.constant 5 : i32
    %c2_i32_101 = arith.constant 2 : i32
    %344 = arith.muli %c5_i32_100, %c2_i32_101 : i32
    %345 = tpu.assume_multiple %344, 2 : i32
    %346 = arith.index_cast %345 : i32 to index
    %c0_102 = arith.constant 0 : index
    %347 = vector.load %arg11[%346, %c0_102] : memref<16x128xf32, #tpu.memory_space<vmem>>, vector<2x128xf32>
    %cst_103 = arith.constant dense<0.000000e+00> : vector<2x128xf32>
    %348 = tpu.matmul %341, %221, %cst_103 {dimension_numbers = #tpu.dot_dimension_numbers<[1], [0], [0], [1], [0, 0, 1, 1], [], []>} : vector<2x32xf32>, vector<32x128xf32>, vector<2x128xf32> -> vector<2x128xf32>
    %349 = arith.addf %347, %348 : vector<2x128xf32>
    %350 = math.tanh %349 : vector<2x128xf32>
    %351 = arith.negf %349 : vector<2x128xf32>
    %352 = math.exp %351 : vector<2x128xf32>
    %cst_104 = arith.constant 1.000000e+00 : f32
    %353 = vector.broadcast %cst_104 : f32 to vector<2x128xf32>
    %354 = arith.addf %353, %352 : vector<2x128xf32>
    %355 = arith.divf %353, %354 : vector<2x128xf32>
    %356 = arith.select %5, %350, %355 : vector<2x128xi1>, vector<2x128xf32>
    %357 = vector.extract_strided_slice %356 {offsets = [0, 0], sizes = [2, 32], strides = [1, 1]} : vector<2x128xf32> to vector<2x32xf32>
    %358 = vector.extract_strided_slice %356 {offsets = [0, 32], sizes = [2, 32], strides = [1, 1]} : vector<2x128xf32> to vector<2x32xf32>
    %359 = vector.extract_strided_slice %356 {offsets = [0, 64], sizes = [2, 32], strides = [1, 1]} : vector<2x128xf32> to vector<2x32xf32>
    %360 = vector.extract_strided_slice %356 {offsets = [0, 96], sizes = [2, 32], strides = [1, 1]} : vector<2x128xf32> to vector<2x32xf32>
    %361 = arith.mulf %358, %339 : vector<2x32xf32>
    %362 = arith.mulf %357, %359 : vector<2x32xf32>
    %363 = arith.addf %361, %362 : vector<2x32xf32>
    %364 = math.tanh %363 : vector<2x32xf32>
    %365 = arith.mulf %360, %364 : vector<2x32xf32>
    %366 = arith.index_cast %345 : i32 to index
    %c0_105 = arith.constant 0 : index
    %367 = vector.load %arg8[%366, %c0_105] : memref<16x32xf32, #tpu.memory_space<vmem>>, vector<2x32xf32>
    tpu.vector_store %arg8[%366, %c0_105], %365 {strides = array<i32>} : memref<16x32xf32, #tpu.memory_space<vmem>>, vector<2x32xf32>,
    %c6_i32_106 = arith.constant 6 : i32
    %c2_i32_107 = arith.constant 2 : i32
    %368 = arith.muli %c6_i32_106, %c2_i32_107 : i32
    %369 = tpu.assume_multiple %368, 2 : i32
    %370 = arith.index_cast %369 : i32 to index
    %c0_108 = arith.constant 0 : index
    %371 = vector.load %arg11[%370, %c0_108] : memref<16x128xf32, #tpu.memory_space<vmem>>, vector<2x128xf32>
    %cst_109 = arith.constant dense<0.000000e+00> : vector<2x128xf32>
    %372 = tpu.matmul %365, %221, %cst_109 {dimension_numbers = #tpu.dot_dimension_numbers<[1], [0], [0], [1], [0, 0, 1, 1], [], []>} : vector<2x32xf32>, vector<32x128xf32>, vector<2x128xf32> -> vector<2x128xf32>
    %373 = arith.addf %371, %372 : vector<2x128xf32>
    %374 = math.tanh %373 : vector<2x128xf32>
    %375 = arith.negf %373 : vector<2x128xf32>
    %376 = math.exp %375 : vector<2x128xf32>
    %cst_110 = arith.constant 1.000000e+00 : f32
    %377 = vector.broadcast %cst_110 : f32 to vector<2x128xf32>
    %378 = arith.addf %377, %376 : vector<2x128xf32>
    %379 = arith.divf %377, %378 : vector<2x128xf32>
    %380 = arith.select %5, %374, %379 : vector<2x128xi1>, vector<2x128xf32>
    %381 = vector.extract_strided_slice %380 {offsets = [0, 0], sizes = [2, 32], strides = [1, 1]} : vector<2x128xf32> to vector<2x32xf32>
    %382 = vector.extract_strided_slice %380 {offsets = [0, 32], sizes = [2, 32], strides = [1, 1]} : vector<2x128xf32> to vector<2x32xf32>
    %383 = vector.extract_strided_slice %380 {offsets = [0, 64], sizes = [2, 32], strides = [1, 1]} : vector<2x128xf32> to vector<2x32xf32>
    %384 = vector.extract_strided_slice %380 {offsets = [0, 96], sizes = [2, 32], strides = [1, 1]} : vector<2x128xf32> to vector<2x32xf32>
    %385 = arith.mulf %382, %363 : vector<2x32xf32>
    %386 = arith.mulf %381, %383 : vector<2x32xf32>
    %387 = arith.addf %385, %386 : vector<2x32xf32>
    %388 = math.tanh %387 : vector<2x32xf32>
    %389 = arith.mulf %384, %388 : vector<2x32xf32>
    %390 = arith.index_cast %369 : i32 to index
    %c0_111 = arith.constant 0 : index
    %391 = vector.load %arg8[%390, %c0_111] : memref<16x32xf32, #tpu.memory_space<vmem>>, vector<2x32xf32>
    tpu.vector_store %arg8[%390, %c0_111], %389 {strides = array<i32>} : memref<16x32xf32, #tpu.memory_space<vmem>>, vector<2x32xf32>,
    %c7_i32_112 = arith.constant 7 : i32
    %c2_i32_113 = arith.constant 2 : i32
    %392 = arith.muli %c7_i32_112, %c2_i32_113 : i32
    %393 = tpu.assume_multiple %392, 2 : i32
    %394 = arith.index_cast %393 : i32 to index
    %c0_114 = arith.constant 0 : index
    %395 = vector.load %arg11[%394, %c0_114] : memref<16x128xf32, #tpu.memory_space<vmem>>, vector<2x128xf32>
    %cst_115 = arith.constant dense<0.000000e+00> : vector<2x128xf32>
    %396 = tpu.matmul %389, %221, %cst_115 {dimension_numbers = #tpu.dot_dimension_numbers<[1], [0], [0], [1], [0, 0, 1, 1], [], []>} : vector<2x32xf32>, vector<32x128xf32>, vector<2x128xf32> -> vector<2x128xf32>
    %397 = arith.addf %395, %396 : vector<2x128xf32>
    %398 = math.tanh %397 : vector<2x128xf32>
    %399 = arith.negf %397 : vector<2x128xf32>
    %400 = math.exp %399 : vector<2x128xf32>
    %cst_116 = arith.constant 1.000000e+00 : f32
    %401 = vector.broadcast %cst_116 : f32 to vector<2x128xf32>
    %402 = arith.addf %401, %400 : vector<2x128xf32>
    %403 = arith.divf %401, %402 : vector<2x128xf32>
    %404 = arith.select %5, %398, %403 : vector<2x128xi1>, vector<2x128xf32>
    %405 = vector.extract_strided_slice %404 {offsets = [0, 0], sizes = [2, 32], strides = [1, 1]} : vector<2x128xf32> to vector<2x32xf32>
    %406 = vector.extract_strided_slice %404 {offsets = [0, 32], sizes = [2, 32], strides = [1, 1]} : vector<2x128xf32> to vector<2x32xf32>
    %407 = vector.extract_strided_slice %404 {offsets = [0, 64], sizes = [2, 32], strides = [1, 1]} : vector<2x128xf32> to vector<2x32xf32>
    %408 = vector.extract_strided_slice %404 {offsets = [0, 96], sizes = [2, 32], strides = [1, 1]} : vector<2x128xf32> to vector<2x32xf32>
    %409 = arith.mulf %406, %387 : vector<2x32xf32>
    %410 = arith.mulf %405, %407 : vector<2x32xf32>
    %411 = arith.addf %409, %410 : vector<2x32xf32>
    %412 = math.tanh %411 : vector<2x32xf32>
    %413 = arith.mulf %408, %412 : vector<2x32xf32>
    %414 = arith.index_cast %393 : i32 to index
    %c0_117 = arith.constant 0 : index
    %415 = vector.load %arg8[%414, %c0_117] : memref<16x32xf32, #tpu.memory_space<vmem>>, vector<2x32xf32>
    tpu.vector_store %arg8[%414, %c0_117], %413 {strides = array<i32>} : memref<16x32xf32, #tpu.memory_space<vmem>>, vector<2x32xf32>,
    %c8_i32_118 = arith.constant 8 : i32
    %c1 = arith.constant 1 : index
    %c0_119 = arith.constant 0 : index
    %c0_120 = arith.constant 0 : index
    %416 = vector.load %arg9[%c1, %c0_119, %c0_120] : memref<2x2x32xf32, #tpu.memory_space<vmem>>, vector<1x2x32xf32>
    %417 = vector.shape_cast %416 : vector<1x2x32xf32> to vector<2x32xf32>
    %418 = vector.shape_cast %413 : vector<2x32xf32> to vector<1x2x32xf32>
    tpu.vector_store %arg9[%c1, %c0_119, %c0_120], %418 {strides = array<i32>} : memref<2x2x32xf32, #tpu.memory_space<vmem>>, vector<1x2x32xf32>,
    %c1_121 = arith.constant 1 : index
    %c0_122 = arith.constant 0 : index
    %c0_123 = arith.constant 0 : index
    %419 = vector.load %arg10[%c1_121, %c0_122, %c0_123] : memref<2x2x32xf32, #tpu.memory_space<vmem>>, vector<1x2x32xf32>
    %420 = vector.shape_cast %419 : vector<1x2x32xf32> to vector<2x32xf32>
    %421 = vector.shape_cast %411 : vector<2x32xf32> to vector<1x2x32xf32>
    tpu.vector_store %arg10[%c1_121, %c0_122, %c0_123], %421 {strides = array<i32>} : memref<2x2x32xf32, #tpu.memory_space<vmem>>, vector<1x2x32xf32>,
    return
  }
  func.func @transform_0(%arg0: i32) -> (i32, i32) {
    %c0_i32 = arith.constant 0 : i32
    %c0_i32_0 = arith.constant 0 : i32
    %c0_i32_1 = arith.constant 0 : i32
    return %c0_i32, %c0_i32_0 : i32, i32
  }
  func.func @transform_1(%arg0: i32) -> (i32, i32) {
    %c0_i32 = arith.constant 0 : i32
    %c0_i32_0 = arith.constant 0 : i32
    %c0_i32_1 = arith.constant 0 : i32
    return %c0_i32, %c0_i32_0 : i32, i32
  }
  func.func @transform_2(%arg0: i32) -> (i32, i32) {
    %c0_i32 = arith.constant 0 : i32
    %c0_i32_0 = arith.constant 0 : i32
    %c0_i32_1 = arith.constant 0 : i32
    return %c0_i32, %c0_i32_0 : i32, i32
  }
  func.func @transform_3(%arg0: i32) -> (i32, i32) {
    %c0_i32 = arith.constant 0 : i32
    %c0_i32_0 = arith.constant 0 : i32
    %c0_i32_1 = arith.constant 0 : i32
    return %c0_i32, %c0_i32_0 : i32, i32
  }
  func.func @transform_4(%arg0: i32) -> (i32, i32) {
    %c0_i32 = arith.constant 0 : i32
    %c0_i32_0 = arith.constant 0 : i32
    %c0_i32_1 = arith.constant 0 : i32
    return %c0_i32, %c0_i32_0 : i32, i32
  }
  func.func @transform_5(%arg0: i32) -> (i32, i32) {
    %c0_i32 = arith.constant 0 : i32
    %c0_i32_0 = arith.constant 0 : i32
    %c0_i32_1 = arith.constant 0 : i32
    return %c0_i32, %c0_i32_0 : i32, i32
  }
  func.func @transform_6(%arg0: i32) -> (i32, i32) {
    %c0_i32 = arith.constant 0 : i32
    %c0_i32_0 = arith.constant 0 : i32
    %c0_i32_1 = arith.constant 0 : i32
    return %c0_i32, %c0_i32_0 : i32, i32
  }
  func.func @transform_7(%arg0: i32) -> (i32, i32) {
    %c0_i32 = arith.constant 0 : i32
    %c0_i32_0 = arith.constant 0 : i32
    %c0_i32_1 = arith.constant 0 : i32
    return %c0_i32, %c0_i32_0 : i32, i32
  }
  func.func @transform_8(%arg0: i32) -> (i32, i32, i32) {
    %c0_i32 = arith.constant 0 : i32
    %c0_i32_0 = arith.constant 0 : i32
    %c0_i32_1 = arith.constant 0 : i32
    %c0_i32_2 = arith.constant 0 : i32
    return %c0_i32, %c0_i32_0, %c0_i32_1 : i32, i32, i32
  }
  func.func @transform_9(%arg0: i32) -> (i32, i32, i32) {
    %c0_i32 = arith.constant 0 : i32
    %c0_i32_0 = arith.constant 0 : i32
    %c0_i32_1 = arith.constant 0 : i32
    %c0_i32_2 = arith.constant 0 : i32
    return %c0_i32, %c0_i32_0, %c0_i32_1 : i32, i32, i32
  }
}

</mosaic_0001>

<bundles_post_ra>
// kernel: variable_length_lstm_forward.1
= control target key start
LH: loop header
LB: loop body
LE: loop exit
PB: predicated region body
PF: predicated region fallthrough
CT: control target
= control target key end

     0   :  { %15 = vsyncpa [#allocation4], 0  ;;  %s3190_s0 = inlined_call_operand.vmem [shape: f32[16,32], index: 0, kind: input, shape index: {}]   ;;  %s3191_s1 = inlined_call_operand.vmem [shape: f32[32,128], index: 1, kind: input, shape index: {}]   ;;  %s3192_s2 = inlined_call_operand.hbm [shape: f32[32,128], index: 2, kind: input, shape index: {}]   ;;  %s3193_s3 = inlined_call_operand.vmem [shape: f32[1,128], index: 3, kind: input, shape index: {}]   ;;  %s3194_s4 = inlined_call_operand.hbm [shape: f32[32,128], index: 4, kind: input, shape index: {}]   ;;  %s3195_s5 = inlined_call_operand.hbm [shape: f32[32,128], index: 5, kind: input, shape index: {}]   ;;  %s3196_s6 = inlined_call_operand.vmem [shape: f32[1,128], index: 6, kind: input, shape index: {}]   ;;  %s3197_s7 = inlined_call_operand.vmem [shape: f32[16,32], index: 7, kind: output, shape index: {0}]   ;;  %s3198_s8 = inlined_call_operand.hbm [shape: f32[2,2,32], index: 8, kind: output, shape index: {1}]   ;;  %s3199_s9 = inlined_call_operand.hbm [shape: f32[2,2,32], index: 9, kind: output, shape index: {2}]  }
   0x1   :  { %16 = vsyncpa [#allocation7], 0 }
   0x2   :  { %17 = vsyncpa [#allocation5], 0 }
   0x3   :  { %18 = vsyncpa [#allocation11], 0  ;;  %s2720_s30 = smov [#allocation6]   ;;  %s2721_s11 = smov [#allocation3]  }
   0x4   :  { %s42_s10 = sshll.u32 %s2720_s30, 4  ;;  %s28_s12 = sshll.u32 %s2721_s11, 4  ;;  %s43_s10 = int_to_ptr.vmem [resolvable:$true] %s42_s10  ;;  %s2784_s12 = int_to_ptr.vmem [resolvable:$true] %s28_s12 }
   0x5   :  { %s2602_s15 = scalar_lea.hbm %s3194_s4, 512 }
   0x6   :  { %p2603_p0 = scmp.ne.s32.totalorder %s3194_s4, %s2602_s15  ;;  %p2606_p1 = scmp.lt.u32.totalorder %s2602_s15, %s3194_s4 }
   0x8   :  { %p2608_p2 = pnand %p2606_p1, %p2603_p0 }
   0xa   :  { %2611 = shalt.err (!%p2608_p2)
}
   0xb   :  { %s2612_s20 = scalar_lea.vmem %s43_s10, 512  ;;  %p2617_p4 = scmp.lt.s32.totalorder %s43_s10, %s43_s10 }
   0xc   :  { %p2613_p3 = scmp.ne.s32.totalorder %s43_s10, %s2612_s20  ;;  %p2618_p5 = scmp.lt.s32.totalorder %s2612_s20, %s2612_s20 }
   0xe   :  { %p2619_p6 = por %p2618_p5, %p2617_p4 }
  0x10   :  { %p2620_p7 = pnand %p2619_p6, %p2613_p3 }
  0x12   :  { %2623 = shalt.err (!%p2620_p7)
}
  0x13   :  { %s2722_s21 = smov 128   ;;  %s2723_s22 = smov 8  }
  0x14   :  { %48 = dma.hbm_to_vmem [thread:$0]  %s3194_s4, 512, %s43_s10, [#allocation7], %s2722_s21, %s2722_s21, %s2723_s22  }
  0x15   :  { %s2624_s27 = scalar_lea.hbm %s3192_s2, 512 }
  0x16   :  { %p2625_p8 = scmp.ne.s32.totalorder %s3192_s2, %s2624_s27  ;;  %p2628_p9 = scmp.lt.u32.totalorder %s2624_s27, %s3192_s2 }
  0x18   :  { %p2630_p10 = pnand %p2628_p9, %p2625_p8 }
  0x1a   :  { %2633 = shalt.err (!%p2630_p10)
}
  0x1b   :  { %s2634_s13 = scalar_lea.vmem %s2784_s12, 512  ;;  %p2639_p12 = scmp.lt.s32.totalorder %s2784_s12, %s2784_s12 }
  0x1c   :  { %p2635_p11 = scmp.ne.s32.totalorder %s2784_s12, %s2634_s13  ;;  %p2640_p13 = scmp.lt.s32.totalorder %s2634_s13, %s2634_s13 }
  0x1e   :  { %p2641_p0 = por %p2640_p13, %p2639_p12 }
  0x20   :  { %p2642_p1 = pnand %p2641_p0, %p2635_p11 }
  0x22   :  { %2645 = shalt.err (!%p2642_p1)
}
  0x23   :  { %34 = dma.hbm_to_vmem [thread:$0]  %s3192_s2, 512, %s2784_s12, [#allocation4], %s2722_s21, %s2722_s21, %s2723_s22  }
  0x24   :  { %s2724_s14 = smov [#allocation8]   ;;  %s2646_s18 = scalar_lea.hbm %s3195_s5, 512 }
  0x25   :  { %s54_s15 = sshll.u32 %s2724_s14, 4  ;;  %p2647_p2 = scmp.ne.s32.totalorder %s3195_s5, %s2646_s18  ;;  %s55_s15 = int_to_ptr.vmem [resolvable:$true] %s54_s15 }
  0x26   :  { %p2650_p3 = scmp.lt.u32.totalorder %s2646_s18, %s3195_s5 }
  0x28   :  { %p2652_p4 = pnand %p2650_p3, %p2647_p2 }
  0x2a   :  { %2655 = shalt.err (!%p2652_p4)
}
  0x2b   :  { %s2656_s25 = scalar_lea.vmem %s55_s15, 512  ;;  %p2661_p6 = scmp.lt.s32.totalorder %s55_s15, %s55_s15 }
  0x2c   :  { %p2657_p5 = scmp.ne.s32.totalorder %s55_s15, %s2656_s25  ;;  %p2662_p7 = scmp.lt.s32.totalorder %s2656_s25, %s2656_s25 }
  0x2e   :  { %p2663_p8 = por %p2662_p7, %p2661_p6 }
  0x30   :  { %p2664_p9 = pnand %p2663_p8, %p2657_p5 }
  0x32   :  { %2667 = shalt.err (!%p2664_p9)
}
  0x33   :  { %60 = dma.hbm_to_vmem [thread:$0]  %s3195_s5, 512, %s55_s15, [#allocation7], %s2722_s21, %s2722_s21, %s2723_s22  }
  0x34   :  { %2712 = dma.done.wait [#allocation4], 512  }
  0x35   :  { %2713 = vsyncadd [#allocation4], 4294966784 }
  0x36   :  { %2714 = dma.done.wait [#allocation7], 1024  }
  0x37   :  { %2715 = vsyncadd [#allocation7], 4294966272  ;;  %v2725_v0 = vmov 0.0|0.0   ;;  %vm2726_vm0 = vmmov 0   ;;  %v2727_v1 = vmov 0.0   ;;  %vm90_vm1 = vcmask 261120  }
  0x38   :  { %2356 = vmatprep.subr.bf16.mxu1 %v2725_v0  ;;  %2169 = vmatprep.mubr.msk.f32.mxu1 %vm2726_vm0, %v2727_v1  ;;  %v79_v2 = vld [vmem:[%s3191_s1] sm:$0xff]  ;;  %v80_v3 = vld [vmem:[%s3191_s1 + $0x8] sm:$0xff]  ;;  %v81_v4 = vld [vmem:[%s3191_s1 + $0x10] sm:$0xff]  ;;  %v72_v27 = vlaneseq  ;;  %s2729_s14 = smov 32   ;;  %vm282_vm5 = vcmask 254976   ;;  %s2730_s12 = smov 96  }
  0x39   :  { %v2348_v5 = vpack.c.bf16 %v80_v3, %v79_v2  ;;  %v82_v6 = vld [vmem:[%s3191_s1 + $0x18] sm:$0xff]  ;;  %v77_v7 = vld [vmem:[%s3190_s0] sm:$0xff]  ;;  %v174_v9 = vld [vmem:[#allocation3] sm:$0xff]  ;;  %s2731_s26 = smov [#allocation10]  }
  0x3a   :  { %v2352_v8 = vpack.c.bf16 %v82_v6, %v81_v4  ;;  %2158 = vmatprep.mubr.msk.f32.mxu0 %vm90_vm1, %v77_v7  ;;  %v175_v10 = vld [vmem:[#allocation3 + $0x8] sm:$0xff]  ;;  %v176_v11 = vld [vmem:[#allocation3 + $0x10] sm:$0xff]  ;;  %v177_v13 = vld [vmem:[#allocation3 + $0x18] sm:$0xff]  ;;  %v73_v29 = vand.u32 127, %v72_v27  ;;  %s1989_s27 = sshll.u32 %s2731_s26, 4  ;;  %s1990_s27 = int_to_ptr.vmem [resolvable:$true] %s1989_s27 }
  0x3b   :  { %2349 = vmatprep.subr.bf16.mxu0 %v2348_v5  ;;  %v2855_v12 = vpack.c.bf16 %v175_v10, %v174_v9  ;;  %v2858_v14 = vpack.c.bf16 %v177_v13, %v176_v11  ;;  %v78_v15 = vld [vmem:[%s3190_s0 + $0x8] sm:$0xff]  ;;  %v2008_v16 = vld [vmem:[%s3193_s3] ss:$0 sm:$0xff]  ;;  %s2728_s3 = smov 64   ;;  %s2668_s28 = scalar_lea.vmem %s1990_s27, 64 }
  0x3c   :  { %2351 = vmatpush3.bf16.msra.mxu0 %v2348_v5  ;;  %vm74_vm2 = vcmp.ge.s32.totalorder %v73_v29, 64  ;;  %vm75_vm3 = vcmp.lt.s32.totalorder %v73_v29, 96  ;;  %p2669_p10 = scmp.ne.s32.totalorder %s1990_s27, %s2668_s28  ;;  %p2673_p11 = scmp.lt.s32.totalorder %s1990_s27, %s1990_s27 }
  0x3d   :  { %2353 = vmatprep.subr.bf16.mxu0 %v2352_v8  ;;  %2358 = vmatpush3.bf16.msra.mxu1 %v2855_v12  ;;  %vm2884_vm4 = vmand %vm74_vm2, %vm75_vm3  ;;  %p2674_p12 = scmp.lt.s32.totalorder %s2668_s28, %s2668_s28 }
  0x3e   :  { %2359 = vmatprep.subr.bf16.mxu1 %v2725_v0 }
  0x3f   :  { %p2675_p13 = por %p2674_p12, %p2673_p11 }
  0x40   :  { %2355 = vmatpush3.bf16.msra.mxu0 %v2352_v8 }
  0x41   :  { %2361 = vmatpush3.bf16.msra.mxu1 %v2858_v14  ;;  %2362 = vmatprep.subr.bf16.mxu0 %v2725_v0  ;;  %p2676_p0 = pnand %p2675_p13, %p2669_p10 }
  0x42   :  { %2368 = vmatprep.subr.bf16.mxu1 %v2725_v0 }
  0x43   :  { %2159 = vmatmul.mubr.msk.f32.vlgmr.msra.gmra.mrb[0].mxu0 %vm90_vm1, %v78_v15 }
  0x44   :  { %2170 = vmatmul.mubr.f32.vlgmr.msra.gmra.mrb[0].mxu1 %v2727_v1  ;;  %2364 = vmatpush3.bf16.msra.mxu0 %v2855_v12 }
  0x45   :  { %2365 = vmatprep.subr.bf16.mxu0 %v2725_v0  ;;  %2180 = vmatprep.mubr.msk.f32.mxu0 %vm2726_vm0, %v2727_v1 }
  0x46   :  { %2370 = vmatpush3.bf16.msra.mxu1 %v2855_v12  ;;  %2191 = vmatprep.mubr.msk.f32.mxu1 %vm2726_vm0, %v2727_v1 }
  0x47   :  { %2371 = vmatprep.subr.bf16.mxu1 %v2725_v0 }
  0x48   :  { %2367 = vmatpush3.bf16.msra.mxu0 %v2858_v14 }
  0x49   :  { %2374 = vmatprep.subr.bf16.mxu0 %v2725_v0 }
  0x4a   :  { %2373 = vmatpush3.bf16.msra.mxu1 %v2858_v14 }
  0x4b   :  { %2380 = vmatprep.subr.bf16.mxu1 %v2725_v0 }
 0x116   :  { %v2160_v17 = vpop.f32.mrb[0].mxu0 }
 0x117   :  { %v169_v18 = vadd.f32 %v2160_v17, %v2008_v16  ;;  %v163_v19 = vpop.f32.mrb[1].mxu0  ;;  %v248_v20 = vpop.f32.mrb[0].mxu1 }
 0x118   :  { %v164_v21 = vadd.f32 %v2008_v16, %v163_v19  ;;  %v2171_v22 = vpop.f32.mrb[1].mxu1 }
 0x119   :  { %173 = vst [vmem:[#allocation2 + $0x8] sm:$0xff] %v169_v18 }
 0x11a   :  { %172 = vst [vmem:[#allocation2] sm:$0xff] %v164_v21 }
 0x121   :  { %v178_v23 = vld [vmem:[#allocation2] sm:$0x3]  ;;  %v285_v43 = vld [vmem:[#allocation2 + $0x2] sm:$0x3]  ;;  %v391_v62 = vld [vmem:[#allocation2 + $0x4] sm:$0x3] }
 0x122   :  { %v252_v24 = vadd.f32 %v248_v20, %v178_v23  ;;  %v497_v21 = vld [vmem:[#allocation2 + $0x6] sm:$0x3] }
 0x124   :  { %v2011_v25 = vmul.f32 -1.442695, %v252_v24 }
 0x126   :  { %2474 = vpow2.f32 %v2011_v25 }
 0x127   :  { %2476 = vtanh.f32 %v252_v24 }
 0x130   :  { %v2475_v26 = vpop.eup %2474 }
 0x131   :  { %v257_v28 = vadd.f32 1.0, %v2475_v26  ;;  %v2477_v31 = vpop.eup %2476 }
 0x133   :  { %2478 = vrcp.f32 %v257_v28 }
 0x13d   :  { %v2479_v32 = vpop.eup %2478 }
 0x13e   :  { %v260_v33 = vsel %vm2884_vm4, %v2477_v31, %v2479_v32 }
 0x13f   :  { %263 = vrot.lane.b32.xlu0 %v260_v33, %s2728_s3  ;;  %v261_v36 = vmul.f32 0.0, %v260_v33 }
 0x1b1   :  { %v264_v34 = vpop.permute.xlu0 %263 }
 0x1b2   :  { %v266_v35 = vmul.f32 %v264_v34, %v260_v33 }
 0x1b4   :  { %268 = vrot.lane.b32.xlu0 %v266_v35, %s2729_s14 }
 0x226   :  { %v269_v37 = vpop.permute.xlu0 %268 }
 0x227   :  { %v271_v38 = vadd.f32 %v269_v37, %v261_v36 }
 0x229   :  { %2480 = vtanh.f32 %v271_v38 }
 0x233   :  { %v2481_v39 = vpop.eup %2480 }
 0x234   :  { %274 = vrot.lane.b32.xlu1 %v2481_v39, %s2728_s3 }
 0x2a6   :  { %v275_v40 = vpop.permute.xlu1 %274 }
 0x2a7   :  { %v277_v41 = vmul.f32 %v275_v40, %v260_v33 }
 0x2a9   :  { %279 = vrot.lane.b32.xlu1 %v277_v41, %s2729_s14  ;;  %v603_v41 = vld [vmem:[#allocation2 + $0x8] sm:$0x3] }
 0x31b   :  { %v280_v42 = vpop.permute.xlu1 %279 }
 0x31c   :  { %283 = vst.msk [vmem:[%s3197_s7] sm:$0x3] %vm282_vm5, %v280_v42  ;;  %2181 = vmatmul.mubr.msk.f32.vlgmr.msra.gmra.mrb[2].mxu0 %vm90_vm1, %v280_v42 }
 0x31d   :  { %2376 = vmatpush3.bf16.msra.mxu0 %v2855_v12  ;;  %2202 = vmatprep.mubr.msk.f32.mxu0 %vm2726_vm0, %v2727_v1 }
 0x31e   :  { %2377 = vmatprep.subr.bf16.mxu0 %v2725_v0 }
 0x321   :  { %2379 = vmatpush3.bf16.msra.mxu0 %v2858_v14 }
 0x322   :  { %2386 = vmatprep.subr.bf16.mxu0 %v2725_v0 }
 0x3ef   :  { %v354_v44 = vpop.f32.mrb[2].mxu0 }
 0x3f0   :  { %v358_v45 = vadd.f32 %v354_v44, %v285_v43  ;;  %v2182_v46 = vpop.f32.mrb[3].mxu0 }
 0x3f2   :  { %v2013_v47 = vmul.f32 -1.442695, %v358_v45 }
 0x3f4   :  { %2482 = vpow2.f32 %v2013_v47 }
 0x3f5   :  { %2484 = vtanh.f32 %v358_v45 }
 0x3fe   :  { %v2483_v48 = vpop.eup %2482 }
 0x3ff   :  { %v363_v49 = vadd.f32 1.0, %v2483_v48  ;;  %v2485_v50 = vpop.eup %2484 }
 0x401   :  { %2486 = vrcp.f32 %v363_v49 }
 0x40b   :  { %v2487_v51 = vpop.eup %2486 }
 0x40c   :  { %v366_v52 = vsel %vm2884_vm4, %v2485_v50, %v2487_v51 }
 0x40d   :  { %369 = vrot.lane.b32.xlu0 %v366_v52, %s2728_s3  ;;  %v367_v55 = vmul.f32 %v366_v52, %v271_v38 }
 0x47f   :  { %v370_v53 = vpop.permute.xlu0 %369 }
 0x480   :  { %v372_v54 = vmul.f32 %v370_v53, %v366_v52 }
 0x482   :  { %374 = vrot.lane.b32.xlu1 %v372_v54, %s2729_s14 }
 0x4f4   :  { %v375_v56 = vpop.permute.xlu1 %374 }
 0x4f5   :  { %v377_v57 = vadd.f32 %v375_v56, %v367_v55 }
 0x4f7   :  { %2488 = vtanh.f32 %v377_v57 }
 0x501   :  { %v2489_v58 = vpop.eup %2488 }
 0x502   :  { %380 = vrot.lane.b32.xlu0 %v2489_v58, %s2728_s3 }
 0x574   :  { %v381_v59 = vpop.permute.xlu0 %380 }
 0x575   :  { %v383_v60 = vmul.f32 %v381_v59, %v366_v52 }
 0x577   :  { %385 = vrot.lane.b32.xlu1 %v383_v60, %s2729_s14  ;;  %v709_v60 = vld [vmem:[#allocation2 + $0xa] sm:$0x3] }
 0x5e9   :  { %v386_v61 = vpop.permute.xlu1 %385 }
 0x5ea   :  { %2014 = vst.msk [vmem:[%s3197_s7 + $0x2] sm:$0x3] %vm282_vm5, %v386_v61  ;;  %2192 = vmatmul.mubr.msk.f32.vlgmr.msra.gmra.mrb[2].mxu1 %vm90_vm1, %v386_v61 }
 0x5eb   :  { %2382 = vmatpush3.bf16.msra.mxu1 %v2855_v12  ;;  %2213 = vmatprep.mubr.msk.f32.mxu1 %vm2726_vm0, %v2727_v1 }
 0x5ec   :  { %2383 = vmatprep.subr.bf16.mxu1 %v2725_v0 }
 0x5ef   :  { %2385 = vmatpush3.bf16.msra.mxu1 %v2858_v14 }
 0x5f0   :  { %2392 = vmatprep.subr.bf16.mxu1 %v2725_v0 }
 0x6bd   :  { %v460_v63 = vpop.f32.mrb[2].mxu1 }
 0x6be   :  { %v464_v2 = vadd.f32 %v460_v63, %v391_v62  ;;  %v2193_v3 = vpop.f32.mrb[3].mxu1 }
 0x6c0   :  { %v2016_v4 = vmul.f32 -1.442695, %v464_v2 }
 0x6c2   :  { %2490 = vpow2.f32 %v2016_v4 }
 0x6c3   :  { %2492 = vtanh.f32 %v464_v2 }
 0x6cc   :  { %v2491_v5 = vpop.eup %2490 }
 0x6cd   :  { %v469_v6 = vadd.f32 1.0, %v2491_v5  ;;  %v2493_v7 = vpop.eup %2492 }
 0x6cf   :  { %2494 = vrcp.f32 %v469_v6 }
 0x6d9   :  { %v2495_v8 = vpop.eup %2494 }
 0x6da   :  { %v472_v9 = vsel %vm2884_vm4, %v2493_v7, %v2495_v8 }
 0x6db   :  { %475 = vrot.lane.b32.xlu0 %v472_v9, %s2728_s3  ;;  %v473_v13 = vmul.f32 %v472_v9, %v377_v57 }
 0x74d   :  { %v476_v10 = vpop.permute.xlu0 %475 }
 0x74e   :  { %v478_v11 = vmul.f32 %v476_v10, %v472_v9 }
 0x750   :  { %480 = vrot.lane.b32.xlu1 %v478_v11, %s2729_s14 }
 0x7c2   :  { %v481_v15 = vpop.permute.xlu1 %480 }
 0x7c3   :  { %v483_v16 = vadd.f32 %v481_v15, %v473_v13 }
 0x7c5   :  { %2496 = vtanh.f32 %v483_v16 }
 0x7cf   :  { %v2497_v17 = vpop.eup %2496 }
 0x7d0   :  { %486 = vrot.lane.b32.xlu0 %v2497_v17, %s2728_s3 }
 0x842   :  { %v487_v18 = vpop.permute.xlu0 %486 }
 0x843   :  { %v489_v19 = vmul.f32 %v487_v18, %v472_v9  ;;  %v815_v18 = vld [vmem:[#allocation2 + $0xc] sm:$0x3] }
 0x845   :  { %491 = vrot.lane.b32.xlu1 %v489_v19, %s2729_s14 }
 0x8b7   :  { %v492_v20 = vpop.permute.xlu1 %491 }
 0x8b8   :  { %2017 = vst.msk [vmem:[%s3197_s7 + $0x4] sm:$0x3] %vm282_vm5, %v492_v20  ;;  %2203 = vmatmul.mubr.msk.f32.vlgmr.msra.gmra.mrb[4].mxu0 %vm90_vm1, %v492_v20 }
 0x8b9   :  { %2388 = vmatpush3.bf16.msra.mxu0 %v2855_v12  ;;  %2224 = vmatprep.mubr.msk.f32.mxu0 %vm2726_vm0, %v2727_v1 }
 0x8ba   :  { %2389 = vmatprep.subr.bf16.mxu0 %v2725_v0 }
 0x8bd   :  { %2391 = vmatpush3.bf16.msra.mxu0 %v2858_v14 }
 0x8be   :  { %2398 = vmatprep.subr.bf16.mxu0 %v2725_v0 }
 0x98b   :  { %v566_v22 = vpop.f32.mrb[4].mxu0 }
 0x98c   :  { %v570_v23 = vadd.f32 %v566_v22, %v497_v21  ;;  %v2204_v24 = vpop.f32.mrb[5].mxu0 }
 0x98e   :  { %v2019_v25 = vmul.f32 -1.442695, %v570_v23 }
 0x990   :  { %2498 = vpow2.f32 %v2019_v25 }
 0x991   :  { %2500 = vtanh.f32 %v570_v23 }
 0x99a   :  { %v2499_v26 = vpop.eup %2498 }
 0x99b   :  { %v575_v27 = vadd.f32 1.0, %v2499_v26  ;;  %v2501_v28 = vpop.eup %2500 }
 0x99d   :  { %2502 = vrcp.f32 %v575_v27 }
 0x9a7   :  { %v2503_v29 = vpop.eup %2502 }
 0x9a8   :  { %v578_v31 = vsel %vm2884_vm4, %v2501_v28, %v2503_v29 }
 0x9a9   :  { %581 = vrot.lane.b32.xlu0 %v578_v31, %s2728_s3  ;;  %v579_v34 = vmul.f32 %v578_v31, %v483_v16 }
 0xa1b   :  { %v582_v32 = vpop.permute.xlu0 %581 }
 0xa1c   :  { %v584_v33 = vmul.f32 %v582_v32, %v578_v31 }
 0xa1e   :  { %586 = vrot.lane.b32.xlu1 %v584_v33, %s2729_s14 }
 0xa90   :  { %v587_v35 = vpop.permute.xlu1 %586 }
 0xa91   :  { %v589_v36 = vadd.f32 %v587_v35, %v579_v34 }
 0xa93   :  { %2504 = vtanh.f32 %v589_v36 }
 0xa9d   :  { %v2505_v37 = vpop.eup %2504 }
 0xa9e   :  { %592 = vrot.lane.b32.xlu0 %v2505_v37, %s2728_s3 }
 0xb10   :  { %v593_v38 = vpop.permute.xlu0 %592 }
 0xb11   :  { %v595_v39 = vmul.f32 %v593_v38, %v578_v31  ;;  %v921_v38 = vld [vmem:[#allocation2 + $0xe] sm:$0x3] }
 0xb13   :  { %597 = vrot.lane.b32.xlu1 %v595_v39, %s2729_s14 }
 0xb85   :  { %v598_v40 = vpop.permute.xlu1 %597 }
 0xb86   :  { %2020 = vst.msk [vmem:[%s3197_s7 + $0x6] sm:$0x3] %vm282_vm5, %v598_v40  ;;  %2214 = vmatmul.mubr.msk.f32.vlgmr.msra.gmra.mrb[4].mxu1 %vm90_vm1, %v598_v40 }
 0xb87   :  { %2394 = vmatpush3.bf16.msra.mxu1 %v2855_v12  ;;  %2235 = vmatprep.mubr.msk.f32.mxu1 %vm2726_vm0, %v2727_v1 }
 0xb88   :  { %2395 = vmatprep.subr.bf16.mxu1 %v2725_v0 }
 0xb8b   :  { %2397 = vmatpush3.bf16.msra.mxu1 %v2858_v14 }
 0xb8d   :  { %v1032_v17 = vld [vmem:[%s3197_s7] sm:$0xff] }
 0xc59   :  { %v672_v42 = vpop.f32.mrb[4].mxu1 }
 0xc5a   :  { %v676_v43 = vadd.f32 %v672_v42, %v603_v41  ;;  %v2215_v44 = vpop.f32.mrb[5].mxu1 }
 0xc5c   :  { %v2022_v45 = vmul.f32 -1.442695, %v676_v43 }
 0xc5e   :  { %2506 = vpow2.f32 %v2022_v45 }
 0xc5f   :  { %2508 = vtanh.f32 %v676_v43 }
 0xc68   :  { %v2507_v46 = vpop.eup %2506 }
 0xc69   :  { %v681_v47 = vadd.f32 1.0, %v2507_v46  ;;  %v2509_v48 = vpop.eup %2508 }
 0xc6b   :  { %2510 = vrcp.f32 %v681_v47 }
 0xc75   :  { %v2511_v49 = vpop.eup %2510 }
 0xc76   :  { %v684_v50 = vsel %vm2884_vm4, %v2509_v48, %v2511_v49 }
 0xc77   :  { %687 = vrot.lane.b32.xlu0 %v684_v50, %s2728_s3  ;;  %v685_v53 = vmul.f32 %v684_v50, %v589_v36 }
 0xce9   :  { %v688_v51 = vpop.permute.xlu0 %687 }
 0xcea   :  { %v690_v52 = vmul.f32 %v688_v51, %v684_v50 }
 0xcec   :  { %692 = vrot.lane.b32.xlu1 %v690_v52, %s2729_s14 }
 0xd5e   :  { %v693_v54 = vpop.permute.xlu1 %692 }
 0xd5f   :  { %v695_v55 = vadd.f32 %v693_v54, %v685_v53  ;;  %v1034_v54 = vld [vmem:[#allocation6] sm:$0xff] }
 0xd61   :  { %2512 = vtanh.f32 %v695_v55 }
 0xd6b   :  { %v2513_v56 = vpop.eup %2512 }
 0xd6c   :  { %698 = vrot.lane.b32.xlu0 %v2513_v56, %s2728_s3 }
 0xdde   :  { %v699_v57 = vpop.permute.xlu0 %698 }
 0xddf   :  { %v701_v58 = vmul.f32 %v699_v57, %v684_v50  ;;  %v1036_v57 = vld [vmem:[#allocation6 + $0x10] sm:$0xff] }
 0xde1   :  { %703 = vrot.lane.b32.xlu1 %v701_v58, %s2729_s14  ;;  %v1037_v58 = vld [vmem:[#allocation6 + $0x18] sm:$0xff] }
 0xe53   :  { %v704_v59 = vpop.permute.xlu1 %703 }
 0xe54   :  { %2023 = vst.msk [vmem:[%s3197_s7 + $0x8] sm:$0x3] %vm282_vm5, %v704_v59  ;;  %2225 = vmatmul.mubr.msk.f32.vlgmr.msra.gmra.mrb[6].mxu0 %vm90_vm1, %v704_v59  ;;  %v2408_v59 = vpack.c.bf16 %v1037_v58, %v1036_v57 }
 0xe55   :  { %2400 = vmatpush3.bf16.msra.mxu0 %v2855_v12  ;;  %2246 = vmatprep.mubr.msk.f32.mxu0 %vm2726_vm0, %v2727_v1 }
 0xe56   :  { %2401 = vmatprep.subr.bf16.mxu0 %v2725_v0 }
 0xe59   :  { %2403 = vmatpush3.bf16.msra.mxu0 %v2858_v14 }
 0xe5a   :  { %2412 = vmatprep.subr.bf16.mxu0 %v2725_v0 }
 0xf27   :  { %v778_v61 = vpop.f32.mrb[6].mxu0 }
 0xf28   :  { %v782_v62 = vadd.f32 %v778_v61, %v709_v60  ;;  %v2226_v63 = vpop.f32.mrb[7].mxu0  ;;  %v1128_v60 = vld [vmem:[#allocation8] sm:$0xff]  ;;  %v1129_v61 = vld [vmem:[#allocation8 + $0x8] sm:$0xff] }
 0xf29   :  { %v3009_v63 = vpack.c.bf16 %v1129_v61, %v1128_v60 }
 0xf2a   :  { %v2025_v2 = vmul.f32 -1.442695, %v782_v62 }
 0xf2c   :  { %2514 = vpow2.f32 %v2025_v2  ;;  %v1131_v2 = vld [vmem:[#allocation8 + $0x18] sm:$0xff] }
 0xf2d   :  { %2516 = vtanh.f32 %v782_v62  ;;  %v1130_v62 = vld [vmem:[#allocation8 + $0x10] sm:$0xff] }
 0xf36   :  { %v2515_v3 = vpop.eup %2514 }
 0xf37   :  { %v787_v4 = vadd.f32 1.0, %v2515_v3  ;;  %v2517_v12 = vpop.eup %2516 }
 0xf39   :  { %2518 = vrcp.f32 %v787_v4 }
 0xf43   :  { %v2519_v5 = vpop.eup %2518 }
 0xf44   :  { %v790_v6 = vsel %vm2884_vm4, %v2517_v12, %v2519_v5  ;;  %v3012_v12 = vpack.c.bf16 %v1131_v2, %v1130_v62 }
 0xf45   :  { %793 = vrot.lane.b32.xlu0 %v790_v6, %s2728_s3  ;;  %v791_v8 = vmul.f32 %v790_v6, %v695_v55  ;;  %v1035_v55 = vld [vmem:[#allocation6 + $0x8] sm:$0xff] }
 0xf46   :  { %v2404_v56 = vpack.c.bf16 %v1035_v55, %v1034_v54 }
 0xf48   :  { %2405 = vmatprep.subr.bf16.mxu1 %v2404_v56 }
 0xfb7   :  { %v794_v14 = vpop.permute.xlu0 %793 }
 0xfb8   :  { %v796_v7 = vmul.f32 %v794_v14, %v790_v6 }
 0xfba   :  { %798 = vrot.lane.b32.xlu1 %v796_v7, %s2729_s14 }
0x102c   :  { %v799_v9 = vpop.permute.xlu1 %798 }
0x102d   :  { %v801_v10 = vadd.f32 %v799_v9, %v791_v8  ;;  %v2033_v8 = vld [vmem:[%s3196_s6] ss:$0 sm:$0xff] }
0x102f   :  { %2520 = vtanh.f32 %v801_v10 }
0x1039   :  { %v2521_v11 = vpop.eup %2520 }
0x103a   :  { %804 = vrot.lane.b32.xlu0 %v2521_v11, %s2728_s3 }
0x10ac   :  { %v805_v13 = vpop.permute.xlu0 %804 }
0x10ad   :  { %v807_v15 = vmul.f32 %v805_v13, %v790_v6 }
0x10af   :  { %809 = vrot.lane.b32.xlu1 %v807_v15, %s2729_s14 }
0x1121   :  { %v810_v16 = vpop.permute.xlu1 %809 }
0x1122   :  { %2026 = vst.msk [vmem:[%s3197_s7 + $0xa] sm:$0x3] %vm282_vm5, %v810_v16  ;;  %2236 = vmatmul.mubr.msk.f32.vlgmr.msra.gmra.mrb[6].mxu1 %vm90_vm1, %v810_v16 }
0x1123   :  { %2257 = vmatprep.mubr.msk.f32.mxu1 %vm90_vm1, %v1032_v17  ;;  %2407 = vmatpush3.bf16.msra.mxu1 %v2404_v56 }
0x1124   :  { %2409 = vmatprep.subr.bf16.mxu1 %v2408_v59 }
0x1127   :  { %2411 = vmatpush3.bf16.msra.mxu1 %v2408_v59 }
0x1128   :  { %2418 = vmatprep.subr.bf16.mxu1 %v2725_v0 }
0x11f5   :  { %v884_v19 = vpop.f32.mrb[6].mxu1 }
0x11f6   :  { %v888_v20 = vadd.f32 %v884_v19, %v815_v18  ;;  %v2237_v21 = vpop.f32.mrb[7].mxu1 }
0x11f8   :  { %v2028_v22 = vmul.f32 -1.442695, %v888_v20 }
0x11fa   :  { %2522 = vpow2.f32 %v2028_v22 }
0x11fb   :  { %2524 = vtanh.f32 %v888_v20 }
0x1204   :  { %v2523_v23 = vpop.eup %2522 }
0x1205   :  { %v893_v24 = vadd.f32 1.0, %v2523_v23  ;;  %v2525_v25 = vpop.eup %2524 }
0x1207   :  { %2526 = vrcp.f32 %v893_v24 }
0x1211   :  { %v2527_v26 = vpop.eup %2526 }
0x1212   :  { %v896_v27 = vsel %vm2884_vm4, %v2525_v25, %v2527_v26 }
0x1213   :  { %899 = vrot.lane.b32.xlu0 %v896_v27, %s2728_s3  ;;  %v897_v31 = vmul.f32 %v896_v27, %v801_v10 }
0x1285   :  { %v900_v28 = vpop.permute.xlu0 %899 }
0x1286   :  { %v902_v29 = vmul.f32 %v900_v28, %v896_v27 }
0x1288   :  { %904 = vrot.lane.b32.xlu1 %v902_v29, %s2729_s14 }
0x12fa   :  { %v905_v32 = vpop.permute.xlu1 %904 }
0x12fb   :  { %v907_v33 = vadd.f32 %v905_v32, %v897_v31 }
0x12fd   :  { %2528 = vtanh.f32 %v907_v33 }
0x1307   :  { %v2529_v34 = vpop.eup %2528 }
0x1308   :  { %910 = vrot.lane.b32.xlu0 %v2529_v34, %s2728_s3 }
0x137a   :  { %v911_v35 = vpop.permute.xlu0 %910 }
0x137b   :  { %v913_v36 = vmul.f32 %v911_v35, %v896_v27 }
0x137d   :  { %915 = vrot.lane.b32.xlu1 %v913_v36, %s2729_s14 }
0x13ef   :  { %v916_v37 = vpop.permute.xlu1 %915 }
0x13f0   :  { %2029 = vst.msk [vmem:[%s3197_s7 + $0xc] sm:$0x3] %vm282_vm5, %v916_v37  ;;  %2247 = vmatmul.mubr.msk.f32.vlgmr.msra.gmra.mrb[8].mxu0 %vm90_vm1, %v916_v37 }
0x13f1   :  { %2268 = vmatprep.mubr.msk.f32.mxu0 %vm2726_vm0, %v2727_v1  ;;  %2414 = vmatpush3.bf16.msra.mxu0 %v3009_v63 }
0x13f2   :  { %2415 = vmatprep.subr.bf16.mxu0 %v2725_v0 }
0x13f5   :  { %2417 = vmatpush3.bf16.msra.mxu0 %v3012_v12 }
0x13f6   :  { %2424 = vmatprep.subr.bf16.mxu0 %v2725_v0 }
0x13f8   :  { %2269 = vmatmul.mubr.f32.vlgmr.msra.gmra.mrb[10].mxu0 %v2727_v1 }
0x13f9   :  { %2426 = vmatpush3.bf16.msra.mxu0 %v3009_v63  ;;  %2290 = vmatprep.mubr.msk.f32.mxu0 %vm2726_vm0, %v2727_v1 }
0x13fa   :  { %2427 = vmatprep.subr.bf16.mxu0 %v2725_v0 }
0x13fd   :  { %2429 = vmatpush3.bf16.msra.mxu0 %v3012_v12 }
0x13fe   :  { %2436 = vmatprep.subr.bf16.mxu0 %v2725_v0 }
0x14c3   :  { %v990_v39 = vpop.f32.mrb[8].mxu0 }
0x14c4   :  { %v994_v40 = vadd.f32 %v990_v39, %v921_v38  ;;  %v2248_v41 = vpop.f32.mrb[9].mxu0 }
0x14c6   :  { %v2031_v42 = vmul.f32 -1.442695, %v994_v40 }
0x14c8   :  { %2530 = vpow2.f32 %v2031_v42 }
0x14c9   :  { %2532 = vtanh.f32 %v994_v40 }
0x14cb   :  { %v1199_v14 = vpop.f32.mrb[10].mxu0 }
0x14cc   :  { %v2270_v7 = vpop.f32.mrb[11].mxu0 }
0x14d2   :  { %v2531_v43 = vpop.eup %2530 }
0x14d3   :  { %v999_v44 = vadd.f32 1.0, %v2531_v43  ;;  %v2533_v45 = vpop.eup %2532 }
0x14d5   :  { %2534 = vrcp.f32 %v999_v44 }
0x14df   :  { %v2535_v46 = vpop.eup %2534 }
0x14e0   :  { %v1002_v47 = vsel %vm2884_vm4, %v2533_v45, %v2535_v46 }
0x14e1   :  { %1005 = vrot.lane.b32.xlu0 %v1002_v47, %s2728_s3  ;;  %v1003_v50 = vmul.f32 %v1002_v47, %v907_v33 }
0x1553   :  { %v1006_v48 = vpop.permute.xlu0 %1005 }
0x1554   :  { %v1008_v49 = vmul.f32 %v1006_v48, %v1002_v47 }
0x1556   :  { %1010 = vrot.lane.b32.xlu1 %v1008_v49, %s2729_s14 }
0x15c8   :  { %v1011_v51 = vpop.permute.xlu1 %1010 }
0x15c9   :  { %v3004_v52 = vadd.f32 %v1011_v51, %v1003_v50 }
0x15cb   :  { %2536 = vtanh.f32 %v3004_v52 }
0x15d5   :  { %v2537_v53 = vpop.eup %2536 }
0x15d6   :  { %1016 = vrot.lane.b32.xlu0 %v2537_v53, %s2728_s3 }
0x1648   :  { %v1017_v3 = vpop.permute.xlu0 %1016 }
0x1649   :  { %v1019_v4 = vmul.f32 %v1017_v3, %v1002_v47 }
0x164b   :  { %1021 = vrot.lane.b32.xlu1 %v1019_v4, %s2729_s14 }
0x16bd   :  { %v1022_v5 = vpop.permute.xlu1 %1021 }
0x16be   :  { %2032 = vst.msk [vmem:[%s3197_s7 + $0xe] sm:$0x3] %vm282_vm5, %v1022_v5  ;;  %1026 = vst.msk [vmem:[#allocation9] sm:$0x3] %vm282_vm5, %v1022_v5 }
0x16c5   :  { %v1033_v6 = vld [vmem:[%s3197_s7 + $0x8] sm:$0xff] }
0x16c6   :  { %2258 = vmatmul.mubr.msk.f32.vlgmr.msra.gmra.mrb[8].mxu1 %vm90_vm1, %v1033_v6 }
0x16c7   :  { %2420 = vmatpush3.bf16.msra.mxu1 %v3009_v63  ;;  %2279 = vmatprep.mubr.msk.f32.mxu1 %vm2726_vm0, %v2727_v1 }
0x16c8   :  { %2421 = vmatprep.subr.bf16.mxu1 %v2725_v0 }
0x16cb   :  { %2423 = vmatpush3.bf16.msra.mxu1 %v3012_v12 }
0x16cc   :  { %2430 = vmatprep.subr.bf16.mxu1 %v2725_v0 }
0x1799   :  { %v2259_v9 = vpop.f32.mrb[8].mxu1 }
0x179a   :  { %v1123_v10 = vadd.f32 %v2259_v9, %v2033_v8  ;;  %v1117_v11 = vpop.f32.mrb[9].mxu1 }
0x179b   :  { %v1118_v13 = vadd.f32 %v2033_v8, %v1117_v11 }
0x179c   :  { %1127 = vst [vmem:[#allocation2 + $0x8] sm:$0xff] %v1123_v10 }
0x179d   :  { %1126 = vst [vmem:[#allocation2] sm:$0xff] %v1118_v13 }
0x17a4   :  { %v1132_v15 = vld [vmem:[#allocation2] sm:$0x3]  ;;  %v1234_v33 = vld [vmem:[#allocation2 + $0x2] sm:$0x3]  ;;  %v1338_v53 = vld [vmem:[#allocation2 + $0x4] sm:$0x3] }
0x17a5   :  { %v1203_v16 = vadd.f32 %v1199_v14, %v1132_v15  ;;  %v1442_v10 = vld [vmem:[#allocation2 + $0x6] sm:$0x3] }
0x17a7   :  { %v2036_v17 = vmul.f32 -1.442695, %v1203_v16 }
0x17a9   :  { %2538 = vpow2.f32 %v2036_v17 }
0x17aa   :  { %2540 = vtanh.f32 %v1203_v16 }
0x17b3   :  { %v2539_v18 = vpop.eup %2538 }
0x17b4   :  { %v1208_v19 = vadd.f32 1.0, %v2539_v18  ;;  %v2541_v20 = vpop.eup %2540 }
0x17b6   :  { %2542 = vrcp.f32 %v1208_v19 }
0x17c0   :  { %v2543_v21 = vpop.eup %2542 }
0x17c1   :  { %v1211_v22 = vsel %vm2884_vm4, %v2541_v20, %v2543_v21 }
0x17c2   :  { %1214 = vrot.lane.b32.xlu0 %v1211_v22, %s2728_s3  ;;  %v1212_v25 = vmul.f32 0.0, %v1211_v22 }
0x1834   :  { %v1215_v23 = vpop.permute.xlu0 %1214 }
0x1835   :  { %v1217_v24 = vmul.f32 %v1215_v23, %v1211_v22 }
0x1837   :  { %1219 = vrot.lane.b32.xlu1 %v1217_v24, %s2729_s14 }
0x18a9   :  { %v1220_v26 = vpop.permute.xlu1 %1219 }
0x18aa   :  { %v1222_v27 = vadd.f32 %v1220_v26, %v1212_v25 }
0x18ac   :  { %2544 = vtanh.f32 %v1222_v27 }
0x18b6   :  { %v2545_v28 = vpop.eup %2544 }
0x18b7   :  { %1225 = vrot.lane.b32.xlu0 %v2545_v28, %s2728_s3 }
0x1929   :  { %v1226_v29 = vpop.permute.xlu0 %1225 }
0x192a   :  { %v1228_v31 = vmul.f32 %v1226_v29, %v1211_v22 }
0x192c   :  { %1230 = vrot.lane.b32.xlu1 %v1228_v31, %s2729_s14 }
0x199e   :  { %v1231_v32 = vpop.permute.xlu1 %1230 }
0x199f   :  { %1233 = vst.msk [vmem:[%s3197_s7] sm:$0x3] %vm282_vm5, %v1231_v32  ;;  %2280 = vmatmul.mubr.msk.f32.vlgmr.msra.gmra.mrb[10].mxu1 %vm90_vm1, %v1231_v32  ;;  %v1546_v32 = vld [vmem:[#allocation2 + $0x8] sm:$0x3] }
0x19a0   :  { %2432 = vmatpush3.bf16.msra.mxu1 %v3009_v63  ;;  %2301 = vmatprep.mubr.msk.f32.mxu1 %vm2726_vm0, %v2727_v1 }
0x19a1   :  { %2433 = vmatprep.subr.bf16.mxu1 %v2725_v0 }
0x19a4   :  { %2435 = vmatpush3.bf16.msra.mxu1 %v3012_v12 }
0x19a5   :  { %2442 = vmatprep.subr.bf16.mxu1 %v2725_v0 }
0x1a72   :  { %v1303_v34 = vpop.f32.mrb[10].mxu1 }
0x1a73   :  { %v1307_v35 = vadd.f32 %v1303_v34, %v1234_v33  ;;  %v2281_v36 = vpop.f32.mrb[11].mxu1 }
0x1a75   :  { %v2038_v37 = vmul.f32 -1.442695, %v1307_v35 }
0x1a77   :  { %2546 = vpow2.f32 %v2038_v37 }
0x1a78   :  { %2548 = vtanh.f32 %v1307_v35 }
0x1a81   :  { %v2547_v38 = vpop.eup %2546 }
0x1a82   :  { %v1312_v39 = vadd.f32 1.0, %v2547_v38  ;;  %v2549_v40 = vpop.eup %2548 }
0x1a84   :  { %2550 = vrcp.f32 %v1312_v39 }
0x1a8e   :  { %v2551_v41 = vpop.eup %2550 }
0x1a8f   :  { %v1315_v42 = vsel %vm2884_vm4, %v2549_v40, %v2551_v41 }
0x1a90   :  { %1318 = vrot.lane.b32.xlu0 %v1315_v42, %s2728_s3  ;;  %v1316_v45 = vmul.f32 %v1315_v42, %v1222_v27 }
0x1b02   :  { %v1319_v43 = vpop.permute.xlu0 %1318 }
0x1b03   :  { %v1321_v44 = vmul.f32 %v1319_v43, %v1315_v42 }
0x1b05   :  { %1323 = vrot.lane.b32.xlu1 %v1321_v44, %s2729_s14 }
0x1b77   :  { %v1324_v46 = vpop.permute.xlu1 %1323 }
0x1b78   :  { %v1326_v47 = vadd.f32 %v1324_v46, %v1316_v45 }
0x1b7a   :  { %2552 = vtanh.f32 %v1326_v47 }
0x1b84   :  { %v2553_v48 = vpop.eup %2552 }
0x1b85   :  { %1329 = vrot.lane.b32.xlu0 %v2553_v48, %s2728_s3 }
0x1bf7   :  { %v1330_v49 = vpop.permute.xlu0 %1329 }
0x1bf8   :  { %v1332_v50 = vmul.f32 %v1330_v49, %v1315_v42 }
0x1bfa   :  { %1334 = vrot.lane.b32.xlu1 %v1332_v50, %s2729_s14 }
0x1c6c   :  { %v1335_v51 = vpop.permute.xlu1 %1334 }
0x1c6d   :  { %2039 = vst.msk [vmem:[%s3197_s7 + $0x2] sm:$0x3] %vm282_vm5, %v1335_v51  ;;  %2291 = vmatmul.mubr.msk.f32.vlgmr.msra.gmra.mrb[12].mxu0 %vm90_vm1, %v1335_v51  ;;  %v1650_v51 = vld [vmem:[#allocation2 + $0xa] sm:$0x3] }
0x1c6e   :  { %2438 = vmatpush3.bf16.msra.mxu0 %v3009_v63  ;;  %2312 = vmatprep.mubr.msk.f32.mxu0 %vm2726_vm0, %v2727_v1 }
0x1c6f   :  { %2439 = vmatprep.subr.bf16.mxu0 %v2725_v0 }
0x1c72   :  { %2441 = vmatpush3.bf16.msra.mxu0 %v3012_v12 }
0x1c73   :  { %2448 = vmatprep.subr.bf16.mxu0 %v2725_v0 }
0x1d40   :  { %v1407_v54 = vpop.f32.mrb[12].mxu0 }
0x1d41   :  { %v1411_v55 = vadd.f32 %v1407_v54, %v1338_v53  ;;  %v2292_v56 = vpop.f32.mrb[13].mxu0 }
0x1d43   :  { %v2041_v57 = vmul.f32 -1.442695, %v1411_v55 }
0x1d45   :  { %2554 = vpow2.f32 %v2041_v57 }
0x1d46   :  { %2556 = vtanh.f32 %v1411_v55 }
0x1d4f   :  { %v2555_v58 = vpop.eup %2554 }
0x1d50   :  { %v1416_v59 = vadd.f32 1.0, %v2555_v58  ;;  %v2557_v60 = vpop.eup %2556 }
0x1d52   :  { %2558 = vrcp.f32 %v1416_v59 }
0x1d5c   :  { %v2559_v61 = vpop.eup %2558 }
0x1d5d   :  { %v1419_v62 = vsel %vm2884_vm4, %v2557_v60, %v2559_v61 }
0x1d5e   :  { %1422 = vrot.lane.b32.xlu0 %v1419_v62, %s2728_s3  ;;  %v1420_v4 = vmul.f32 %v1419_v62, %v1326_v47 }
0x1dd0   :  { %v1423_v2 = vpop.permute.xlu0 %1422 }
0x1dd1   :  { %v1425_v3 = vmul.f32 %v1423_v2, %v1419_v62 }
0x1dd3   :  { %1427 = vrot.lane.b32.xlu1 %v1425_v3, %s2729_s14 }
0x1e45   :  { %v1428_v5 = vpop.permute.xlu1 %1427 }
0x1e46   :  { %v1430_v6 = vadd.f32 %v1428_v5, %v1420_v4 }
0x1e48   :  { %2560 = vtanh.f32 %v1430_v6 }
0x1e52   :  { %v2561_v14 = vpop.eup %2560 }
0x1e53   :  { %1433 = vrot.lane.b32.xlu0 %v2561_v14, %s2728_s3 }
0x1ec5   :  { %v1434_v7 = vpop.permute.xlu0 %1433 }
0x1ec6   :  { %v1436_v8 = vmul.f32 %v1434_v7, %v1419_v62 }
0x1ec8   :  { %1438 = vrot.lane.b32.xlu1 %v1436_v8, %s2729_s14 }
0x1f3a   :  { %v1439_v9 = vpop.permute.xlu1 %1438 }
0x1f3b   :  { %2042 = vst.msk [vmem:[%s3197_s7 + $0x4] sm:$0x3] %vm282_vm5, %v1439_v9  ;;  %2302 = vmatmul.mubr.msk.f32.vlgmr.msra.gmra.mrb[12].mxu1 %vm90_vm1, %v1439_v9 }
0x1f3c   :  { %2444 = vmatpush3.bf16.msra.mxu1 %v3009_v63  ;;  %2323 = vmatprep.mubr.msk.f32.mxu1 %vm2726_vm0, %v2727_v1 }
0x1f3d   :  { %2445 = vmatprep.subr.bf16.mxu1 %v2725_v0 }
0x1f40   :  { %2447 = vmatpush3.bf16.msra.mxu1 %v3012_v12 }
0x1f41   :  { %2454 = vmatprep.subr.bf16.mxu1 %v2725_v0 }
0x200e   :  { %v1511_v11 = vpop.f32.mrb[12].mxu1 }
0x200f   :  { %v1515_v13 = vadd.f32 %v1511_v11, %v1442_v10  ;;  %v2303_v15 = vpop.f32.mrb[13].mxu1 }
0x2011   :  { %v2044_v16 = vmul.f32 -1.442695, %v1515_v13 }
0x2013   :  { %2562 = vpow2.f32 %v2044_v16 }
0x2014   :  { %2564 = vtanh.f32 %v1515_v13 }
0x201d   :  { %v2563_v17 = vpop.eup %2562 }
0x201e   :  { %v1520_v18 = vadd.f32 1.0, %v2563_v17  ;;  %v2565_v19 = vpop.eup %2564 }
0x2020   :  { %2566 = vrcp.f32 %v1520_v18 }
0x202a   :  { %v2567_v20 = vpop.eup %2566 }
0x202b   :  { %v1523_v21 = vsel %vm2884_vm4, %v2565_v19, %v2567_v20 }
0x202c   :  { %1526 = vrot.lane.b32.xlu0 %v1523_v21, %s2728_s3  ;;  %v1524_v24 = vmul.f32 %v1523_v21, %v1430_v6  ;;  %v1754_v6 = vld [vmem:[#allocation2 + $0xc] sm:$0x3] }
0x209e   :  { %v1527_v22 = vpop.permute.xlu0 %1526 }
0x209f   :  { %v1529_v23 = vmul.f32 %v1527_v22, %v1523_v21 }
0x20a1   :  { %1531 = vrot.lane.b32.xlu1 %v1529_v23, %s2729_s14 }
0x2113   :  { %v1532_v25 = vpop.permute.xlu1 %1531 }
0x2114   :  { %v1534_v26 = vadd.f32 %v1532_v25, %v1524_v24 }
0x2116   :  { %2568 = vtanh.f32 %v1534_v26 }
0x2120   :  { %v2569_v27 = vpop.eup %2568 }
0x2121   :  { %1537 = vrot.lane.b32.xlu0 %v2569_v27, %s2728_s3 }
0x2193   :  { %v1538_v28 = vpop.permute.xlu0 %1537 }
0x2194   :  { %v1540_v29 = vmul.f32 %v1538_v28, %v1523_v21 }
0x2196   :  { %1542 = vrot.lane.b32.xlu1 %v1540_v29, %s2729_s14 }
0x2208   :  { %v1543_v31 = vpop.permute.xlu1 %1542 }
0x2209   :  { %2045 = vst.msk [vmem:[%s3197_s7 + $0x6] sm:$0x3] %vm282_vm5, %v1543_v31  ;;  %2313 = vmatmul.mubr.msk.f32.vlgmr.msra.gmra.mrb[14].mxu0 %vm90_vm1, %v1543_v31 }
0x220a   :  { %2450 = vmatpush3.bf16.msra.mxu0 %v3009_v63  ;;  %2334 = vmatprep.mubr.msk.f32.mxu0 %vm2726_vm0, %v2727_v1 }
0x220b   :  { %2451 = vmatprep.subr.bf16.mxu0 %v2725_v0 }
0x220e   :  { %2453 = vmatpush3.bf16.msra.mxu0 %v3012_v12 }
0x22dc   :  { %v1615_v33 = vpop.f32.mrb[14].mxu0 }
0x22dd   :  { %v1619_v34 = vadd.f32 %v1615_v33, %v1546_v32  ;;  %v2314_v35 = vpop.f32.mrb[15].mxu0 }
0x22df   :  { %v2047_v36 = vmul.f32 -1.442695, %v1619_v34 }
0x22e1   :  { %2570 = vpow2.f32 %v2047_v36 }
0x22e2   :  { %2572 = vtanh.f32 %v1619_v34 }
0x22eb   :  { %v2571_v37 = vpop.eup %2570 }
0x22ec   :  { %v1624_v38 = vadd.f32 1.0, %v2571_v37  ;;  %v2573_v39 = vpop.eup %2572 }
0x22ee   :  { %2574 = vrcp.f32 %v1624_v38 }
0x22f8   :  { %v2575_v40 = vpop.eup %2574 }
0x22f9   :  { %v1627_v41 = vsel %vm2884_vm4, %v2573_v39, %v2575_v40 }
0x22fa   :  { %1630 = vrot.lane.b32.xlu0 %v1627_v41, %s2728_s3  ;;  %v1628_v44 = vmul.f32 %v1627_v41, %v1534_v26  ;;  %v1858_v26 = vld [vmem:[#allocation2 + $0xe] sm:$0x3] }
0x236c   :  { %v1631_v42 = vpop.permute.xlu0 %1630 }
0x236d   :  { %v1633_v43 = vmul.f32 %v1631_v42, %v1627_v41 }
0x236f   :  { %1635 = vrot.lane.b32.xlu1 %v1633_v43, %s2729_s14 }
0x23e1   :  { %v1636_v45 = vpop.permute.xlu1 %1635 }
0x23e2   :  { %v1638_v46 = vadd.f32 %v1636_v45, %v1628_v44 }
0x23e4   :  { %2576 = vtanh.f32 %v1638_v46 }
0x23ee   :  { %v2577_v47 = vpop.eup %2576 }
0x23ef   :  { %1641 = vrot.lane.b32.xlu0 %v2577_v47, %s2728_s3 }
0x2461   :  { %v1642_v48 = vpop.permute.xlu0 %1641 }
0x2462   :  { %v1644_v49 = vmul.f32 %v1642_v48, %v1627_v41 }
0x2464   :  { %1646 = vrot.lane.b32.xlu1 %v1644_v49, %s2729_s14 }
0x24d6   :  { %v1647_v50 = vpop.permute.xlu1 %1646 }
0x24d7   :  { %2048 = vst.msk [vmem:[%s3197_s7 + $0x8] sm:$0x3] %vm282_vm5, %v1647_v50  ;;  %2324 = vmatmul.mubr.msk.f32.vlgmr.msra.gmra.mrb[14].mxu1 %vm90_vm1, %v1647_v50 }
0x24d8   :  { %2456 = vmatpush3.bf16.msra.mxu1 %v3009_v63  ;;  %2345 = vmatprep.mubr.msk.f32.mxu1 %vm2726_vm0, %v2727_v1 }
0x24d9   :  { %2457 = vmatprep.subr.bf16.mxu1 %v2725_v0 }
0x24dc   :  { %2459 = vmatpush3.bf16.msra.mxu1 %v3012_v12 }
0x25aa   :  { %v1719_v53 = vpop.f32.mrb[14].mxu1 }
0x25ab   :  { %v1723_v54 = vadd.f32 %v1719_v53, %v1650_v51  ;;  %v2325_v55 = vpop.f32.mrb[15].mxu1 }
0x25ad   :  { %v2050_v56 = vmul.f32 -1.442695, %v1723_v54 }
0x25af   :  { %2578 = vpow2.f32 %v2050_v56 }
0x25b0   :  { %2580 = vtanh.f32 %v1723_v54 }
0x25b9   :  { %v2579_v57 = vpop.eup %2578 }
0x25ba   :  { %v1728_v58 = vadd.f32 1.0, %v2579_v57  ;;  %v2581_v59 = vpop.eup %2580 }
0x25bc   :  { %2582 = vrcp.f32 %v1728_v58 }
0x25c6   :  { %v2583_v60 = vpop.eup %2582 }
0x25c7   :  { %v1731_v63 = vsel %vm2884_vm4, %v2581_v59, %v2583_v60 }
0x25c8   :  { %1734 = vrot.lane.b32.xlu0 %v1731_v63, %s2728_s3  ;;  %v1732_v12 = vmul.f32 %v1731_v63, %v1638_v46 }
0x263a   :  { %v1735_v0 = vpop.permute.xlu0 %1734 }
0x263b   :  { %v1737_v1 = vmul.f32 %v1735_v0, %v1731_v63 }
0x263d   :  { %1739 = vrot.lane.b32.xlu1 %v1737_v1, %s2729_s14 }
0x26af   :  { %v1740_v61 = vpop.permute.xlu1 %1739 }
0x26b0   :  { %v1742_v62 = vadd.f32 %v1740_v61, %v1732_v12 }
0x26b2   :  { %2584 = vtanh.f32 %v1742_v62 }
0x26bc   :  { %v2585_v2 = vpop.eup %2584 }
0x26bd   :  { %1745 = vrot.lane.b32.xlu0 %v2585_v2, %s2728_s3 }
0x272f   :  { %v1746_v3 = vpop.permute.xlu0 %1745 }
0x2730   :  { %v1748_v4 = vmul.f32 %v1746_v3, %v1731_v63 }
0x2732   :  { %1750 = vrot.lane.b32.xlu1 %v1748_v4, %s2729_s14 }
0x27a4   :  { %v1751_v5 = vpop.permute.xlu1 %1750 }
0x27a5   :  { %2051 = vst.msk [vmem:[%s3197_s7 + $0xa] sm:$0x3] %vm282_vm5, %v1751_v5  ;;  %2335 = vmatmul.mubr.msk.f32.vlgmr.msra.gmra.mrb[16].mxu0 %vm90_vm1, %v1751_v5 }
0x2878   :  { %v1823_v14 = vpop.f32.mrb[16].mxu0 }
0x2879   :  { %v1827_v7 = vadd.f32 %v1823_v14, %v1754_v6  ;;  %v2336_v8 = vpop.f32.mrb[17].mxu0 }
0x287b   :  { %v2053_v9 = vmul.f32 -1.442695, %v1827_v7 }
0x287d   :  { %2586 = vpow2.f32 %v2053_v9 }
0x287e   :  { %2588 = vtanh.f32 %v1827_v7 }
0x2887   :  { %v2587_v10 = vpop.eup %2586 }
0x2888   :  { %v1832_v11 = vadd.f32 1.0, %v2587_v10  ;;  %v2589_v13 = vpop.eup %2588 }
0x288a   :  { %2590 = vrcp.f32 %v1832_v11 }
0x2894   :  { %v2591_v15 = vpop.eup %2590 }
0x2895   :  { %v1835_v16 = vsel %vm2884_vm4, %v2589_v13, %v2591_v15 }
0x2896   :  { %1838 = vrot.lane.b32.xlu0 %v1835_v16, %s2728_s3  ;;  %v1836_v19 = vmul.f32 %v1835_v16, %v1742_v62 }
0x2908   :  { %v1839_v17 = vpop.permute.xlu0 %1838 }
0x2909   :  { %v1841_v18 = vmul.f32 %v1839_v17, %v1835_v16 }
0x290b   :  { %1843 = vrot.lane.b32.xlu1 %v1841_v18, %s2729_s14 }
0x297d   :  { %v1844_v20 = vpop.permute.xlu1 %1843 }
0x297e   :  { %v1846_v21 = vadd.f32 %v1844_v20, %v1836_v19 }
0x2980   :  { %2592 = vtanh.f32 %v1846_v21 }
0x298a   :  { %v2593_v22 = vpop.eup %2592 }
0x298b   :  { %1849 = vrot.lane.b32.xlu0 %v2593_v22, %s2728_s3 }
0x29fd   :  { %v1850_v23 = vpop.permute.xlu0 %1849 }
0x29fe   :  { %v1852_v24 = vmul.f32 %v1850_v23, %v1835_v16 }
0x2a00   :  { %1854 = vrot.lane.b32.xlu1 %v1852_v24, %s2729_s14 }
0x2a72   :  { %v1855_v25 = vpop.permute.xlu1 %1854 }
0x2a73   :  { %2054 = vst.msk [vmem:[%s3197_s7 + $0xc] sm:$0x3] %vm282_vm5, %v1855_v25  ;;  %2346 = vmatmul.mubr.msk.f32.vlgmr.msra.gmra.mrb[16].mxu1 %vm90_vm1, %v1855_v25 }
0x2b46   :  { %v1927_v27 = vpop.f32.mrb[16].mxu1 }
0x2b47   :  { %v1931_v28 = vadd.f32 %v1927_v27, %v1858_v26  ;;  %v2347_v29 = vpop.f32.mrb[17].mxu1 }
0x2b49   :  { %v2056_v31 = vmul.f32 -1.442695, %v1931_v28 }
0x2b4b   :  { %2594 = vpow2.f32 %v2056_v31 }
0x2b4c   :  { %2596 = vtanh.f32 %v1931_v28 }
0x2b55   :  { %v2595_v32 = vpop.eup %2594 }
0x2b56   :  { %v1936_v33 = vadd.f32 1.0, %v2595_v32  ;;  %v2597_v34 = vpop.eup %2596 }
0x2b58   :  { %2598 = vrcp.f32 %v1936_v33 }
0x2b62   :  { %v2599_v35 = vpop.eup %2598 }
0x2b63   :  { %v1939_v36 = vsel %vm2884_vm4, %v2597_v34, %v2599_v35 }
0x2b64   :  { %1942 = vrot.lane.b32.xlu0 %v1939_v36, %s2728_s3  ;;  %v1940_v39 = vmul.f32 %v1939_v36, %v1846_v21 }
0x2bd6   :  { %v1943_v37 = vpop.permute.xlu0 %1942 }
0x2bd7   :  { %v1945_v38 = vmul.f32 %v1943_v37, %v1939_v36 }
0x2bd9   :  { %1947 = vrot.lane.b32.xlu1 %v1945_v38, %s2729_s14 }
0x2bdd   :  { %1028 = vrot.lane.b32.xlu1 %v3004_v52, %s2730_s12 }
0x2c4b   :  { %v1948_v40 = vpop.permute.xlu1 %1947 }
0x2c4c   :  { %v1950_v41 = vadd.f32 %v1948_v40, %v1940_v39 }
0x2c4e   :  { %2600 = vtanh.f32 %v1950_v41  ;;  %1965 = vrot.lane.b32.xlu1 %v1950_v41, %s2730_s12 }
0x2c4f   :  { %v1029_v42 = vpop.permute.xlu1 %1028 }
0x2c50   :  { %1031 = vst.msk [vmem:[#allocation10] sm:$0x3] %vm282_vm5, %v1029_v42 }
0x2c58   :  { %v2601_v43 = vpop.eup %2600 }
0x2c59   :  { %1953 = vrot.lane.b32.xlu0 %v2601_v43, %s2728_s3 }
0x2cc0   :  { %v1966_v30 = vpop.permute.xlu1 %1965 }
0x2cc1   :  { %1969 = vst.msk [vmem:[#allocation10 + $0x2] sm:$0x3] %vm282_vm5, %v1966_v30 }
0x2cc2   :  { %2679 = shalt.err (!%p2676_p0)
}
0x2cc3   :  { %s2680_s21 = scalar_lea.hbm %s3199_s9, 64 }
0x2cc4   :  { %p2681_p1 = scmp.ne.s32.totalorder %s3199_s9, %s2680_s21  ;;  %p2684_p2 = scmp.lt.u32.totalorder %s2680_s21, %s3199_s9 }
0x2cc6   :  { %p2686_p3 = pnand %p2684_p2, %p2681_p1 }
0x2cc8   :  { %2689 = shalt.err (!%p2686_p3)
}
0x2cc9   :  { %s2732_s13 = smov 2   ;;  %s2733_s4 = smov [#allocation9]  }
0x2cca   :  { %1995 = dma.vmem_to_hbm [thread:$0]  %s1990_s27, 64, %s3199_s9, [#allocation11], %s2729_s14, %s2729_s14, %s2732_s13  }
0x2ccb   :  { %v1954_v52 = vpop.permute.xlu0 %1953  ;;  %s1977_s0 = sshll.u32 %s2733_s4, 4  ;;  %s1978_s0 = int_to_ptr.vmem [resolvable:$true] %s1977_s0 }
0x2ccc   :  { %v1956_v44 = vmul.f32 %v1954_v52, %v1939_v36  ;;  %s2690_s16 = scalar_lea.vmem %s1978_s0, 64  ;;  %p2695_p5 = scmp.lt.s32.totalorder %s1978_s0, %s1978_s0 }
0x2ccd   :  { %p2691_p4 = scmp.ne.s32.totalorder %s1978_s0, %s2690_s16  ;;  %p2696_p6 = scmp.lt.s32.totalorder %s2690_s16, %s2690_s16 }
0x2cce   :  { %1958 = vrot.lane.b32.xlu0 %v1956_v44, %s2729_s14 }
0x2ccf   :  { %p2697_p7 = por %p2696_p6, %p2695_p5 }
0x2cd1   :  { %p2698_p8 = pnand %p2697_p7, %p2691_p4 }
0x2d40   :  { %v1959_v45 = vpop.permute.xlu0 %1958 }
0x2d41   :  { %2057 = vst.msk [vmem:[%s3197_s7 + $0xe] sm:$0x3] %vm282_vm5, %v1959_v45  ;;  %1963 = vst.msk [vmem:[#allocation9 + $0x2] sm:$0x3] %vm282_vm5, %v1959_v45 }
0x2d42   :  { %2701 = shalt.err (!%p2698_p8)
}
0x2d43   :  { %s2702_s18 = scalar_lea.hbm %s3198_s8, 64 }
0x2d44   :  { %p2703_p9 = scmp.ne.s32.totalorder %s3198_s8, %s2702_s18  ;;  %p2706_p10 = scmp.lt.u32.totalorder %s2702_s18, %s3198_s8 }
0x2d46   :  { %p2708_p11 = pnand %p2706_p10, %p2703_p9 }
0x2d48   :  { %2711 = shalt.err (!%p2708_p11)
}
0x2d49   :  { %1983 = dma.vmem_to_hbm [thread:$0]  %s1978_s0, 64, %s3198_s8, [#allocation5], %s2729_s14, %s2729_s14, %s2732_s13  }
0x2d4a   :  { %2716 = dma.done.wait [#allocation5], 64  }
0x2d4b   :  { %2717 = vsyncadd [#allocation5], 4294967232 }
0x2d4c   :  { %2718 = dma.done.wait [#allocation11], 64  }
0x2d4d   :  { %2719 = vsyncadd [#allocation11], 4294967232 }
0x2d4e   :  { %2004 = vsyncpa [#allocation4], 1 }
0x2d4f   :  { %2005 = vsyncpa [#allocation7], 1 }
0x2d50   :  { %2006 = vsyncpa [#allocation5], 1 }
0x2d51   :  { %2007 = vsyncpa [#allocation11], 1 }

</bundles_post_ra>
